<compile_context>
chip_gen: v7x
topology: tpu7x:2x2x1
jax: 0.10.0
libtpu: 0.0.40
codegen_flags: <defaults>
</compile_context>

<pallas_src>
import math

import jax
import jax.numpy as jnp
from jax.experimental import pallas as pl
from jax.experimental.pallas import tpu as pltpu


_VMEM_LIMIT = 32 * 1024 * 1024    # explicit scoped-VMEM budget (portable: v5e/v6e/v7x)
_MM_TILE = 512                    # target rows per tile for the M-gridded matmuls


def _round_up(x, m):
    return ((x + m - 1) // m) * m


def _sigmoid(x):
    return 1.0 / (1.0 + jnp.exp(-x))


# ----------------------------- Pallas kernels -----------------------------

def _make_mm_kernel(swish):
    # y = x @ w (MXU, f32 accumulation); y = y*scale + shift; optional Swish (f32 epilogue)
    def kernel(x_ref, w_ref, scale_ref, shift_ref, o_ref):
        w = w_ref[...]
        y = jnp.dot(x_ref[...].astype(w.dtype), w,
                    preferred_element_type=jnp.float32)
        y = y * scale_ref[...] + shift_ref[...]
        if swish:
            y = y * _sigmoid(y)
        o_ref[...] = y.astype(o_ref.dtype)
    return kernel


def matmul_affine(x2d, w, scale, shift, swish, tile_m=_MM_TILE):
    m, cin = x2d.shape
    cout = w.shape[1]
    tm = min(tile_m, _round_up(m, 8))
    mp = _round_up(m, tm)
    if mp != m:
        x2d = jnp.pad(x2d, ((0, mp - m), (0, 0)))
    scale2 = scale.reshape(1, cout).astype(jnp.float32)
    shift2 = shift.reshape(1, cout).astype(jnp.float32)
    out = pl.pallas_call(
        _make_mm_kernel(swish),
        out_shape=jax.ShapeDtypeStruct((mp, cout), jnp.float32),
        grid=(mp // tm,),
        in_specs=[
            pl.BlockSpec((tm, cin), lambda i: (i, 0)),
            pl.BlockSpec((cin, cout), lambda i: (0, 0)),   # resident (constant index_map)
            pl.BlockSpec((1, cout), lambda i: (0, 0)),
            pl.BlockSpec((1, cout), lambda i: (0, 0)),
        ],
        out_specs=pl.BlockSpec((tm, cout), lambda i: (i, 0)),
        compiler_params=pltpu.CompilerParams(
            dimension_semantics=("parallel",),
            vmem_limit_bytes=_VMEM_LIMIT),
    )(x2d, w, scale2, shift2)
    return out if mp == m else out[:m]


def _make_dw_kernel(kk):
    # depthwise conv as a static sum over K*K taps (VPU, f32), fused BN + Swish
    def kernel(p_ref, w_ref, scale_ref, shift_ref, o_ref):
        acc = p_ref[0] * w_ref[0]
        for t in range(1, kk):
            acc = acc + p_ref[t] * w_ref[t]
        y = acc * scale_ref[...] + shift_ref[...]
        y = y * _sigmoid(y)
        o_ref[...] = y.astype(o_ref.dtype)
    return kernel


def depthwise_conv_bn_swish(x, w_taps, scale, shift, k, stride):
    # TODO(synk): better still: index the k*k shifted windows from the padded activation
    # in-kernel (halo rows) instead of materializing the tap stack in HBM; tiling the
    # stack over M at least bounds VMEM and pipelines the DMA.
    n, h, w_sp, c = x.shape
    p = k // 2
    xpad = jnp.pad(x, ((0, 0), (p, p), (p, p), (0, 0)))
    ho = (h + 2 * p - k) // stride + 1
    wo = (w_sp + 2 * p - k) // stride + 1
    kk = k * k
    taps = []
    for i in range(k):
        for j in range(k):
            taps.append(xpad[:, i:i + (ho - 1) * stride + 1:stride,
                                j:j + (wo - 1) * stride + 1:stride, :])
    m = n * ho * wo
    patches = jnp.stack(taps, axis=0).reshape(kk, m, c)

    # keep the per-buffer tap slab around ~4 MiB so double-buffering fits all chips
    budget_rows = max(8, (4 * 1024 * 1024) // (kk * c * 4))
    tm = max(8, (min(_MM_TILE, budget_rows, _round_up(m, 8)) // 8) * 8)
    mp = _round_up(m, tm)
    if mp != m:
        patches = jnp.pad(patches, ((0, 0), (0, mp - m), (0, 0)))

    out = pl.pallas_call(
        _make_dw_kernel(kk),
        out_shape=jax.ShapeDtypeStruct((mp, c), jnp.float32),
        grid=(mp // tm,),
        in_specs=[
            pl.BlockSpec((kk, tm, c), lambda i: (0, i, 0)),
            pl.BlockSpec((kk, 1, c), lambda i: (0, 0, 0)),  # resident
            pl.BlockSpec((1, c), lambda i: (0, 0)),
            pl.BlockSpec((1, c), lambda i: (0, 0)),
        ],
        out_specs=pl.BlockSpec((tm, c), lambda i: (i, 0)),
        compiler_params=pltpu.CompilerParams(
            dimension_semantics=("parallel",),
            vmem_limit_bytes=_VMEM_LIMIT),
    )(patches, w_taps,
      scale.reshape(1, c).astype(jnp.float32),
      shift.reshape(1, c).astype(jnp.float32))
    return out[:m].reshape(n, ho, wo, c)


def _make_pool_kernel(inv_hw):
    # tiled global-average-pool: accumulate (N, C) partial sums in VMEM scratch
    def kernel(x_ref, o_ref, acc_ref):
        j = pl.program_id(0)

        @pl.when(j == 0)
        def _():
            acc_ref[...] = jnp.zeros_like(acc_ref)

        acc_ref[...] += jnp.sum(x_ref[...], axis=1)

        @pl.when(j == pl.num_programs(0) - 1)
        def _():
            o_ref[...] = (acc_ref[...] * inv_hw).astype(o_ref.dtype)
    return kernel


def global_avg_pool(x):
    n, h, w_sp, c = x.shape
    hw = h * w_sp
    x3 = x.reshape(n, hw, c)
    thw = min(_MM_TILE, _round_up(hw, 8))
    hwp = _round_up(hw, thw)
    if hwp != hw:
        x3 = jnp.pad(x3, ((0, 0), (0, hwp - hw), (0, 0)))  # zero pad: sum unaffected
    return pl.pallas_call(
        _make_pool_kernel(1.0 / float(hw)),
        out_shape=jax.ShapeDtypeStruct((n, c), jnp.float32),
        grid=(hwp // thw,),
        in_specs=[pl.BlockSpec((n, thw, c), lambda j: (0, j, 0))],
        out_specs=pl.BlockSpec((n, c), lambda j: (0, 0)),
        scratch_shapes=[pltpu.VMEM((n, c), jnp.float32)],
        compiler_params=pltpu.CompilerParams(
            dimension_semantics=("arbitrary",),
            vmem_limit_bytes=_VMEM_LIMIT),
    )(x3)


def _make_reduce_kernel(has_residual):
    # fused MBConv tail:  y = (x * sigmoid(gate)) @ w ; y = y*scale + shift ; (+ residual)
    if has_residual:
        def kernel(x_ref, g_ref, w_ref, scale_ref, shift_ref, r_ref, o_ref):
            g = _sigmoid(g_ref[0])                  # (1, Cexp), f32
            xs = x_ref[0] * g                       # SE gate fused (f32 VPU)
            w = w_ref[...]
            y = jnp.dot(xs.astype(w.dtype), w, preferred_element_type=jnp.float32)
            y = y * scale_ref[...] + shift_ref[...]
            o_ref[0] = (y + r_ref[0]).astype(o_ref.dtype)
    else:
        def kernel(x_ref, g_ref, w_ref, scale_ref, shift_ref, o_ref):
            g = _sigmoid(g_ref[0])
            xs = x_ref[0] * g
            w = w_ref[...]
            y = jnp.dot(xs.astype(w.dtype), w, preferred_element_type=jnp.float32)
            y = y * scale_ref[...] + shift_ref[...]
            o_ref[0] = y.astype(o_ref.dtype)
    return kernel


def reduce_pw_fused(x, gate, w, scale, shift, residual=None, tile_hw=_MM_TILE):
    n, h, w_sp, cexp = x.shape
    cout = w.shape[1]
    hw = h * w_sp
    x3 = x.reshape(n, hw, cexp)
    thw = min(tile_hw, _round_up(hw, 8))
    hwp = _round_up(hw, thw)
    if hwp != hw:
        x3 = jnp.pad(x3, ((0, 0), (0, hwp - hw), (0, 0)))
    g3 = gate.reshape(n, 1, cexp).astype(jnp.float32)
    scale2 = scale.reshape(1, cout).astype(jnp.float32)
    shift2 = shift.reshape(1, cout).astype(jnp.float32)

    in_specs = [
        pl.BlockSpec((1, thw, cexp), lambda b, j: (b, j, 0)),
        pl.BlockSpec((1, 1, cexp), lambda b, j: (b, 0, 0)),
        pl.BlockSpec((cexp, cout), lambda b, j: (0, 0)),   # resident
        pl.BlockSpec((1, cout), lambda b, j: (0, 0)),
        pl.BlockSpec((1, cout), lambda b, j: (0, 0)),
    ]
    args = [x3, g3, w, scale2, shift2]
    if residual is not None:
        r3 = residual.reshape(n, hw, cout)
        if hwp != hw:
            r3 = jnp.pad(r3, ((0, 0), (0, hwp - hw), (0, 0)))
        in_specs.append(pl.BlockSpec((1, thw, cout), lambda b, j: (b, j, 0)))
        args.append(r3)

    out = pl.pallas_call(
        _make_reduce_kernel(residual is not None),
        out_shape=jax.ShapeDtypeStruct((n, hwp, cout), jnp.float32),
        grid=(n, hwp // thw),
        in_specs=in_specs,
        out_specs=pl.BlockSpec((1, thw, cout), lambda b, j: (b, j, 0)),
        compiler_params=pltpu.CompilerParams(
            dimension_semantics=("parallel", "parallel"),
            vmem_limit_bytes=_VMEM_LIMIT),
    )(*args)
    return out[:, :hw, :].reshape(n, h, w_sp, cout)


# --------------------------- conv wrappers (glue) ---------------------------

def pointwise_conv(x, w, scale, shift, swish):
    n, h, w_sp, cin = x.shape
    cout = w.shape[1]
    y = matmul_affine(x.reshape(n * h * w_sp, cin), w, scale, shift, swish)
    return y.reshape(n, h, w_sp, cout)


def conv2d_bn_swish(x, w_mat, scale, shift, k, stride):
    # regular conv via im2col (glue) + tiled Pallas matmul (compute)
    n, h, w_sp, cin = x.shape
    p = k // 2
    xpad = jnp.pad(x, ((0, 0), (p, p), (p, p), (0, 0)))
    ho = (h + 2 * p - k) // stride + 1
    wo = (w_sp + 2 * p - k) // stride + 1
    cols = []
    for i in range(k):
        for j in range(k):
            cols.append(xpad[:, i:i + (ho - 1) * stride + 1:stride,
                                j:j + (wo - 1) * stride + 1:stride, :])
    patches = jnp.concatenate(cols, axis=-1).reshape(n * ho * wo, k * k * cin)
    kdim = k * k * cin
    kpad = _round_up(kdim, 8)            # align MXU contraction dim (e.g. 27 -> 32)
    if kpad != kdim:
        patches = jnp.pad(patches, ((0, 0), (0, kpad - kdim)))
        w_mat = jnp.pad(w_mat, ((0, kpad - kdim), (0, 0)))
    cout = w_mat.shape[1]
    y = matmul_affine(patches, w_mat, scale, shift, True)
    return y.reshape(n, ho, wo, cout)


# ----------------------------- parameter setup -----------------------------

def scale_width(w, w_factor):
    w *= w_factor
    new_w = int(w + 4) // 8 * 8
    new_w = max(8, new_w)
    if new_w < 0.9 * w:
        new_w += 8
    return int(new_w)


class KeyGen:
    def __init__(self, seed):
        self.key = jax.random.PRNGKey(seed)

    def __call__(self):
        self.key, sub = jax.random.split(self.key)
        return sub


def _bn_fold(kg, cout, conv_bias=None):
    gamma = 1.0 + 0.1 * jax.random.normal(kg(), (cout,), jnp.float32)
    beta = 0.05 * jax.random.normal(kg(), (cout,), jnp.float32)
    mean = 0.05 * jax.random.normal(kg(), (cout,), jnp.float32)
    var = 1.0 + 0.1 * jax.random.uniform(kg(), (cout,), jnp.float32)
    eps = 1e-5
    s = gamma / jnp.sqrt(var + eps)
    b = beta - mean * s
    if conv_bias is not None:
        b = b + conv_bias * s
    return s, b


def build_efficientnet_params(seed, input_channels, output_channels,
                              w_factor, d_factor,
                              base_widths=((32, 16), (16, 24), (24, 40), (40, 80),
                                           (80, 112), (112, 192), (192, 320), (320, 1280)),
                              base_depths=(1, 2, 2, 3, 3, 4, 1),
                              kernel_sizes=(3, 3, 5, 3, 5, 5, 3),
                              strides=(1, 2, 2, 2, 1, 2, 1)):
    kg = KeyGen(seed)
    scaled_widths = [(scale_width(w[0], w_factor), scale_width(w[1], w_factor))
                     for w in base_widths]
    scaled_depths = [math.ceil(d_factor * d) for d in base_depths]

    def conv_w(cin, cout, kk=1):
        # dense / pointwise weights stored bf16 for the MXU; f32 accumulation in-kernel
        fan_in = cin * kk
        return (jax.random.normal(kg(), (kk * cin, cout), jnp.float32)
                / jnp.sqrt(float(fan_in))).astype(jnp.bfloat16)

    params = {}
    stem_cout = scaled_widths[0][0]
    params['stem'] = dict(w=conv_w(input_channels, stem_cout, 9),
                          bn=_bn_fold(kg, stem_cout))

    stages = []
    for i in range(7):
        i_ch, o_ch = scaled_widths[i]
        expansion = 1 if i == 0 else 6
        r = 4 if i == 0 else 24
        blocks = []
        for layer in range(scaled_depths[i]):
            cin = i_ch if layer == 0 else o_ch
            cout = o_ch
            stride = strides[i] if layer == 0 else None   # faithful to trw.create_stage
            expanded = expansion * cin
            k = kernel_sizes[i]
            blk = dict(
                kernel=k,
                stride=stride,
                skip=(cin == cout and stride == 1),
                expand=None if expansion == 1 else dict(
                    w=conv_w(cin, expanded), bn=_bn_fold(kg, expanded)),
                dw=dict(
                    w=(jax.random.normal(kg(), (k * k, 1, expanded), jnp.float32)
                       / float(k)),
                    bn=_bn_fold(kg, expanded)),
                se=dict(
                    w1=conv_w(expanded, max(1, expanded // r)),
                    b1=0.05 * jax.random.normal(kg(), (max(1, expanded // r),), jnp.float32),
                    w2=conv_w(max(1, expanded // r), expanded),
                    b2=0.05 * jax.random.normal(kg(), (expanded,), jnp.float32)),
                reduce=dict(w=conv_w(expanded, cout), bn=_bn_fold(kg, cout)),
            )
            blocks.append(blk)
        stages.append(blocks)
    params['stages'] = stages

    c_in, c_out = scaled_widths[-1]
    pre_b = 0.05 * jax.random.normal(kg(), (c_out,), jnp.float32)
    params['pre_head'] = dict(w=conv_w(c_in, c_out),
                              bn=_bn_fold(kg, c_out, conv_bias=pre_b))

    params['head'] = dict(
        w=conv_w(c_out, output_channels),
        b=0.05 * jax.random.normal(kg(), (output_channels,), jnp.float32))
    return params


# ------------------------------- forward pass -------------------------------

def mbconv_forward(x, blk):
    residual = x
    if blk['expand'] is not None:
        # TODO(synk): fuse expand 1x1 + depthwise per spatial tile to keep the 6x
        # expanded activation in VMEM instead of round-tripping it through HBM.
        s, b = blk['expand']['bn']
        x = pointwise_conv(x, blk['expand']['w'], s, b, swish=True)
    stride = blk['stride'] if blk['stride'] is not None else 1
    s, b = blk['dw']['bn']
    x = depthwise_conv_bn_swish(x, blk['dw']['w'], s, b, blk['kernel'], stride)

    # squeeze-and-excite (tiny FCs); the sigmoid gate itself is applied fused
    # into the reduce-conv kernel below.
    pooled = global_avg_pool(x)                                    # (N, Cexp)
    ones_r = jnp.ones((blk['se']['w1'].shape[1],), jnp.float32)
    hdn = matmul_affine(pooled, blk['se']['w1'], ones_r, blk['se']['b1'], swish=True)
    ones_c = jnp.ones((x.shape[-1],), jnp.float32)
    gate = matmul_affine(hdn, blk['se']['w2'], ones_c, blk['se']['b2'], swish=False)

    # fused: x*sigmoid(gate) -> 1x1 reduce conv -> BN -> (+ residual)
    s, b = blk['reduce']['bn']
    # TODO(synk): DropSample is stochastic only in training mode; identity in eval.
    x = reduce_pw_fused(x, gate, blk['reduce']['w'], s, b,
                        residual=residual if blk['skip'] else None)
    return x


def efficientnet_forward(x_nchw, params):
    # layout: convert PyTorch NCHW -> NHWC once
    x = jnp.transpose(x_nchw, (0, 2, 3, 1)).astype(jnp.float32)
    s, b = params['stem']['bn']
    x = conv2d_bn_swish(x, params['stem']['w'], s, b, k=3, stride=2)
    for stage in params['stages']:
        for blk in stage:
            x = mbconv_forward(x, blk)
    s, b = params['pre_head']['bn']
    x = pointwise_conv(x, params['pre_head']['w'], s, b, swish=True)
    x = global_avg_pool(x)                       # AdaptiveAvgPool2d(1) + Flatten
    ones = jnp.ones((params['head']['w'].shape[1],), jnp.float32)
    out = matmul_affine(x, params['head']['w'], ones, params['head']['b'], swish=False)
    return out


# ----------------------------------- main -----------------------------------

if __name__ == "__main__":
    key = jax.random.PRNGKey(0)
    batch, in_ch, hw = 2, 3, 32
    out_classes = 10
    x = jax.random.normal(key, (batch, in_ch, hw, hw), jnp.float32)  # NCHW input

    # small-but-faithful EfficientNet: w_factor/d_factor are constructor args
    params = build_efficientnet_params(seed=0, input_channels=in_ch,
                                       output_channels=out_classes,
                                       w_factor=0.25, d_factor=0.2)

    y = efficientnet_forward(x, params)
    y = jax.block_until_ready(y)
    assert y.shape == (batch, out_classes), y.shape
    assert bool(jnp.all(jnp.isfinite(y)))
    print("KERNEL_OK")
</pallas_src>

<mosaic_0001>
module attributes {stable_mosaic.version = 11 : i64} {
  func.func @kernel(%arg0: i32, %arg1: memref<512x32xf32, #tpu.memory_space<vmem>>, %arg2: memref<32x8xbf16, #tpu.memory_space<vmem>>, %arg3: memref<1x8xf32, #tpu.memory_space<vmem>>, %arg4: memref<1x8xf32, #tpu.memory_space<vmem>>, %arg5: memref<512x8xf32, #tpu.memory_space<vmem>>) attributes {dimension_semantics = [#tpu.dimension_semantics<parallel>], iteration_bounds = array<i64: 1>, scalar_prefetch = 0 : i64, scratch_operands = 0 : i64, tpu.core_type = #tpu.core_type<tc>, window_params = [{transform_indices = @transform_0, window_bounds = array<i64: 512, 32>}, {pipeline_mode = #tpu.pipeline_mode<synchronous>, transform_indices = @transform_1, window_bounds = array<i64: 32, 8>}, {pipeline_mode = #tpu.pipeline_mode<synchronous>, transform_indices = @transform_2, window_bounds = array<i64: 1, 8>}, {pipeline_mode = #tpu.pipeline_mode<synchronous>, transform_indices = @transform_3, window_bounds = array<i64: 1, 8>}, {transform_indices = @transform_4, window_bounds = array<i64: 512, 8>}]} {
    %c0 = arith.constant 0 : index
    %c0_0 = arith.constant 0 : index
    %0 = vector.load %arg2[%c0, %c0_0] : memref<32x8xbf16, #tpu.memory_space<vmem>>, vector<32x8xbf16>
    %c0_1 = arith.constant 0 : index
    %c0_2 = arith.constant 0 : index
    %1 = vector.load %arg1[%c0_1, %c0_2] : memref<512x32xf32, #tpu.memory_space<vmem>>, vector<512x32xf32>
    %2 = arith.truncf %1 : vector<512x32xf32> to vector<512x32xbf16>
    %cst = arith.constant dense<0.000000e+00> : vector<512x8xf32>
    %3 = tpu.matmul %2, %0, %cst {dimension_numbers = #tpu.dot_dimension_numbers<[1], [0], [0], [1], [0, 0, 1, 1], [], []>} : vector<512x32xbf16>, vector<32x8xbf16>, vector<512x8xf32> -> vector<512x8xf32>
    %c0_3 = arith.constant 0 : index
    %c0_4 = arith.constant 0 : index
    %4 = vector.load %arg3[%c0_3, %c0_4] : memref<1x8xf32, #tpu.memory_space<vmem>>, vector<1x8xf32>
    %5 = vector.broadcast %4 : vector<1x8xf32> to vector<512x8xf32>
    %6 = arith.mulf %3, %5 : vector<512x8xf32>
    %c0_5 = arith.constant 0 : index
    %c0_6 = arith.constant 0 : index
    %7 = vector.load %arg4[%c0_5, %c0_6] : memref<1x8xf32, #tpu.memory_space<vmem>>, vector<1x8xf32>
    %8 = vector.broadcast %7 : vector<1x8xf32> to vector<512x8xf32>
    %9 = arith.addf %6, %8 : vector<512x8xf32>
    %cst_7 = arith.constant 0.000000e+00 : f32
    %10 = vector.broadcast %cst_7 : f32 to vector<512x8xf32>
    %11 = arith.subf %10, %9 : vector<512x8xf32>
    %12 = math.exp %11 : vector<512x8xf32>
    %cst_8 = arith.constant 1.000000e+00 : f32
    %13 = vector.broadcast %cst_8 : f32 to vector<512x8xf32>
    %14 = arith.addf %13, %12 : vector<512x8xf32>
    %cst_9 = arith.constant 1.000000e+00 : f32
    %15 = vector.broadcast %cst_9 : f32 to vector<512x8xf32>
    %16 = arith.divf %15, %14 : vector<512x8xf32>
    %17 = arith.mulf %9, %16 : vector<512x8xf32>
    %c0_10 = arith.constant 0 : index
    %c0_11 = arith.constant 0 : index
    %18 = vector.load %arg5[%c0_10, %c0_11] : memref<512x8xf32, #tpu.memory_space<vmem>>, vector<512x8xf32>
    tpu.vector_store %arg5[%c0_10, %c0_11], %17 {strides = array<i32>} : memref<512x8xf32, #tpu.memory_space<vmem>>, vector<512x8xf32>,
    return
  }
  func.func @transform_0(%arg0: i32) -> (i32, i32) {
    %c0_i32 = arith.constant 0 : i32
    %c0_i32_0 = arith.constant 0 : i32
    return %arg0, %c0_i32 : i32, i32
  }
  func.func @transform_1(%arg0: i32) -> (i32, i32) {
    %c0_i32 = arith.constant 0 : i32
    %c0_i32_0 = arith.constant 0 : i32
    %c0_i32_1 = arith.constant 0 : i32
    return %c0_i32, %c0_i32_0 : i32, i32
  }
  func.func @transform_2(%arg0: i32) -> (i32, i32) {
    %c0_i32 = arith.constant 0 : i32
    %c0_i32_0 = arith.constant 0 : i32
    %c0_i32_1 = arith.constant 0 : i32
    return %c0_i32, %c0_i32_0 : i32, i32
  }
  func.func @transform_3(%arg0: i32) -> (i32, i32) {
    %c0_i32 = arith.constant 0 : i32
    %c0_i32_0 = arith.constant 0 : i32
    %c0_i32_1 = arith.constant 0 : i32
    return %c0_i32, %c0_i32_0 : i32, i32
  }
  func.func @transform_4(%arg0: i32) -> (i32, i32) {
    %c0_i32 = arith.constant 0 : i32
    %c0_i32_0 = arith.constant 0 : i32
    return %arg0, %c0_i32 : i32, i32
  }
}

</mosaic_0001>

<bundles_post_ra>
// kernel: tpu_custom_call.1
= control target key start
LH: loop header
LB: loop body
LE: loop exit
PB: predicated region body
PF: predicated region fallthrough
CT: control target
= control target key end

     0   :  { %vm130_vm0 = vcmask 261120   ;;  %vm1106_vm1 = vcmask 64512   ;;  %s2663_s1 = inlined_call_operand.vmem [shape: bf16[32,8], index: 1, kind: input, shape index: {}]   ;;  %s2664_s0 = inlined_call_operand.vmem [shape: f32[512,32], index: 0, kind: input, shape index: {}]   ;;  %s2665_s2 = inlined_call_operand.vmem [shape: f32[1,8], index: 2, kind: input, shape index: {}]   ;;  %s2666_s3 = inlined_call_operand.vmem [shape: f32[1,8], index: 3, kind: input, shape index: {}]   ;;  %s2667_s4 = inlined_call_operand.vmem [shape: f32[512,8], index: 4, kind: output, shape index: {}]  }
   0x1   :  { %v1317_v0 = vld [vmem:[%s2663_s1] sm:$0xff]   ;;  %v1318_v1 = vld [vmem:[%s2663_s1 + $0x8] sm:$0xff]   ;;  %v24_v7 = vld [vmem:[%s2664_s0 + $0x10] sm:$0xff] }
   0x2   :  { %1245 = vmatprep.subr.bf16.mxu0 %v1317_v0  ;;  %1313 = vmatprep.subr.bf16.mxu1 %v1317_v0  ;;  %v22_v2 = vld [vmem:[%s2664_s0] sm:$0xff]  ;;  %v23_v3 = vld [vmem:[%s2664_s0 + $0x8] sm:$0xff]  ;;  %v25_v8 = vld [vmem:[%s2664_s0 + $0x18] sm:$0xff] }
   0x3   :  { %v54_v4 = vld [vmem:[%s2664_s0 + $0x100] sm:$0xff]  ;;  %1246 = vmatpush3.bf16.msra.mxu0 %v1317_v0  ;;  %1315 = vmatpush3.bf16.msra.mxu1 %v1317_v0  ;;  %v86_v5 = vpack.c.bf16 %v23_v3, %v22_v2  ;;  %v55_v6 = vld [vmem:[%s2664_s0 + $0x108] sm:$0xff]  ;;  %v56_v10 = vld [vmem:[%s2664_s0 + $0x110] sm:$0xff]  ;;  %v87_v16 = vpack.c.bf16 %v25_v8, %v24_v7 }
   0x4   :  { %1247 = vmatprep.subr.bf16.mxu0 %v1318_v1  ;;  %1314 = vmatprep.subr.bf16.mxu1 %v1318_v1  ;;  %v102_v9 = vpack.c.bf16 %v55_v6, %v54_v4  ;;  %v57_v11 = vld [vmem:[%s2664_s0 + $0x118] sm:$0xff]  ;;  %v26_v12 = vld [vmem:[%s2664_s0 + $0x20] sm:$0xff]  ;;  %v27_v13 = vld [vmem:[%s2664_s0 + $0x28] sm:$0xff] }
   0x5   :  { %1249 = vmatprep.mubr.msk.bf16.mxu0 %vm130_vm0, %v86_v5  ;;  %v58_v14 = vld [vmem:[%s2664_s0 + $0x120] sm:$0xff]  ;;  %v59_v15 = vld [vmem:[%s2664_s0 + $0x128] sm:$0xff]  ;;  %v103_v17 = vpack.c.bf16 %v57_v11, %v56_v10  ;;  %v88_v18 = vpack.c.bf16 %v27_v13, %v26_v12  ;;  %v28_v20 = vld [vmem:[%s2664_s0 + $0x30] sm:$0xff] }
   0x6   :  { %1281 = vmatprep.mubr.msk.bf16.mxu1 %vm130_vm0, %v102_v9  ;;  %v104_v19 = vpack.c.bf16 %v59_v15, %v58_v14  ;;  %v29_v21 = vld [vmem:[%s2664_s0 + $0x38] sm:$0xff]  ;;  %v60_v22 = vld [vmem:[%s2664_s0 + $0x130] sm:$0xff]  ;;  %v30_v24 = vld [vmem:[%s2664_s0 + $0x40] sm:$0xff] }
   0x7   :  { %1248 = vmatpush3.bf16.msra.mxu0 %v1318_v1  ;;  %1316 = vmatpush3.bf16.msra.mxu1 %v1318_v1  ;;  %v61_v23 = vld [vmem:[%s2664_s0 + $0x138] sm:$0xff]  ;;  %v31_v25 = vld [vmem:[%s2664_s0 + $0x48] sm:$0xff]  ;;  %v62_v26 = vld [vmem:[%s2664_s0 + $0x140] sm:$0xff]  ;;  %v89_v28 = vpack.c.bf16 %v29_v21, %v28_v20 }
   0x8   :  { %v63_v27 = vld [vmem:[%s2664_s0 + $0x148] sm:$0xff]  ;;  %v105_v29 = vpack.c.bf16 %v61_v23, %v60_v22  ;;  %v90_v30 = vpack.c.bf16 %v31_v25, %v30_v24  ;;  %v32_v32 = vld [vmem:[%s2664_s0 + $0x50] sm:$0xff]  ;;  %v33_v33 = vld [vmem:[%s2664_s0 + $0x58] sm:$0xff] }
   0x9   :  { %v106_v31 = vpack.c.bf16 %v63_v27, %v62_v26  ;;  %v64_v34 = vld [vmem:[%s2664_s0 + $0x150] sm:$0xff]  ;;  %v65_v35 = vld [vmem:[%s2664_s0 + $0x158] sm:$0xff]  ;;  %v34_v36 = vld [vmem:[%s2664_s0 + $0x60] sm:$0xff]  ;;  %v91_v40 = vpack.c.bf16 %v33_v33, %v32_v32 }
   0xa   :  { %1250 = vmatmul.mubr.msk.bf16.vlgmr.msra.gmra.mrb[0].mxu0 %vm130_vm0, %v87_v16  ;;  %1282 = vmatmul.mubr.msk.bf16.vlgmr.msra.gmra.mrb[0].mxu1 %vm130_vm0, %v103_v17  ;;  %v35_v37 = vld [vmem:[%s2664_s0 + $0x68] sm:$0xff]  ;;  %v66_v38 = vld [vmem:[%s2664_s0 + $0x160] sm:$0xff]  ;;  %v107_v41 = vpack.c.bf16 %v65_v35, %v64_v34  ;;  %v36_v44 = vld [vmem:[%s2664_s0 + $0x70] sm:$0xff] }
   0xb   :  { %1253 = vmatprep.mubr.msk.bf16.mxu0 %vm130_vm0, %v88_v18  ;;  %1285 = vmatprep.mubr.msk.bf16.mxu1 %vm130_vm0, %v104_v19  ;;  %v67_v39 = vld [vmem:[%s2664_s0 + $0x168] sm:$0xff]  ;;  %v92_v42 = vpack.c.bf16 %v35_v37, %v34_v36  ;;  %v37_v45 = vld [vmem:[%s2664_s0 + $0x78] sm:$0xff]  ;;  %v68_v46 = vld [vmem:[%s2664_s0 + $0x170] sm:$0xff] }
   0xc   :  { %v108_v43 = vpack.c.bf16 %v67_v39, %v66_v38  ;;  %v69_v47 = vld [vmem:[%s2664_s0 + $0x178] sm:$0xff]  ;;  %v38_v48 = vld [vmem:[%s2664_s0 + $0x80] sm:$0xff]  ;;  %v39_v49 = vld [vmem:[%s2664_s0 + $0x88] sm:$0xff]  ;;  %v93_v52 = vpack.c.bf16 %v37_v45, %v36_v44 }
   0xd   :  { %v70_v50 = vld [vmem:[%s2664_s0 + $0x180] sm:$0xff]  ;;  %v71_v51 = vld [vmem:[%s2664_s0 + $0x188] sm:$0xff]  ;;  %v109_v53 = vpack.c.bf16 %v69_v47, %v68_v46  ;;  %v94_v54 = vpack.c.bf16 %v39_v49, %v38_v48  ;;  %v40_v56 = vld [vmem:[%s2664_s0 + $0x90] sm:$0xff] }
   0xe   :  { %v110_v55 = vpack.c.bf16 %v71_v51, %v70_v50  ;;  %v41_v57 = vld [vmem:[%s2664_s0 + $0x98] sm:$0xff]  ;;  %v72_v58 = vld [vmem:[%s2664_s0 + $0x190] sm:$0xff]  ;;  %v42_v60 = vld [vmem:[%s2664_s0 + $0xa0] sm:$0xff] }
   0xf   :  { %v73_v59 = vld [vmem:[%s2664_s0 + $0x198] sm:$0xff]  ;;  %v43_v61 = vld [vmem:[%s2664_s0 + $0xa8] sm:$0xff]  ;;  %v74_v62 = vld [vmem:[%s2664_s0 + $0x1a0] sm:$0xff]  ;;  %v95_v0 = vpack.c.bf16 %v41_v57, %v40_v56 }
  0x10   :  { %v75_v63 = vld [vmem:[%s2664_s0 + $0x1a8] sm:$0xff]  ;;  %v111_v1 = vpack.c.bf16 %v73_v59, %v72_v58  ;;  %v96_v2 = vpack.c.bf16 %v43_v61, %v42_v60  ;;  %v44_v4 = vld [vmem:[%s2664_s0 + $0xb0] sm:$0xff]  ;;  %v45_v5 = vld [vmem:[%s2664_s0 + $0xb8] sm:$0xff] }
  0x11   :  { %v112_v3 = vpack.c.bf16 %v75_v63, %v74_v62  ;;  %v76_v6 = vld [vmem:[%s2664_s0 + $0x1b0] sm:$0xff]  ;;  %v77_v7 = vld [vmem:[%s2664_s0 + $0x1b8] sm:$0xff]  ;;  %v46_v8 = vld [vmem:[%s2664_s0 + $0xc0] sm:$0xff]  ;;  %v97_v12 = vpack.c.bf16 %v45_v5, %v44_v4 }
  0x12   :  { %1254 = vmatmul.mubr.msk.bf16.gmra.mrb[4].mxu0 %vm130_vm0, %v89_v28  ;;  %1286 = vmatmul.mubr.msk.bf16.gmra.mrb[4].mxu1 %vm130_vm0, %v105_v29  ;;  %v47_v9 = vld [vmem:[%s2664_s0 + $0xc8] sm:$0xff]  ;;  %v78_v10 = vld [vmem:[%s2664_s0 + $0x1c0] sm:$0xff]  ;;  %v113_v13 = vpack.c.bf16 %v77_v7, %v76_v6  ;;  %v48_v16 = vld [vmem:[%s2664_s0 + $0xd0] sm:$0xff] }
  0x13   :  { %1257 = vmatprep.mubr.msk.bf16.mxu0 %vm130_vm0, %v90_v30  ;;  %1289 = vmatprep.mubr.msk.bf16.mxu1 %vm130_vm0, %v106_v31  ;;  %v79_v11 = vld [vmem:[%s2664_s0 + $0x1c8] sm:$0xff]  ;;  %v98_v14 = vpack.c.bf16 %v47_v9, %v46_v8  ;;  %v49_v17 = vld [vmem:[%s2664_s0 + $0xd8] sm:$0xff]  ;;  %v80_v18 = vld [vmem:[%s2664_s0 + $0x1d0] sm:$0xff] }
  0x14   :  { %v114_v15 = vpack.c.bf16 %v79_v11, %v78_v10  ;;  %v81_v19 = vld [vmem:[%s2664_s0 + $0x1d8] sm:$0xff]  ;;  %v50_v20 = vld [vmem:[%s2664_s0 + $0xe0] sm:$0xff]  ;;  %v51_v21 = vld [vmem:[%s2664_s0 + $0xe8] sm:$0xff]  ;;  %v99_v24 = vpack.c.bf16 %v49_v17, %v48_v16 }
  0x15   :  { %v82_v22 = vld [vmem:[%s2664_s0 + $0x1e0] sm:$0xff]  ;;  %v83_v23 = vld [vmem:[%s2664_s0 + $0x1e8] sm:$0xff]  ;;  %v115_v25 = vpack.c.bf16 %v81_v19, %v80_v18  ;;  %v100_v26 = vpack.c.bf16 %v51_v21, %v50_v20  ;;  %v52_v28 = vld [vmem:[%s2664_s0 + $0xf0] sm:$0xff] }
  0x16   :  { %v116_v27 = vpack.c.bf16 %v83_v23, %v82_v22  ;;  %v53_v29 = vld [vmem:[%s2664_s0 + $0xf8] sm:$0xff]  ;;  %v84_v30 = vld [vmem:[%s2664_s0 + $0x1f0] sm:$0xff]  ;;  %v1835_v34 = vld [vmem:[%s2665_s2] ss:$0 sm:$0xff] }
  0x17   :  { %v85_v31 = vld [vmem:[%s2664_s0 + $0x1f8] sm:$0xff]  ;;  %v101_v32 = vpack.c.bf16 %v53_v29, %v52_v28  ;;  %v1840_v36 = vld [vmem:[%s2666_s3] ss:$0 sm:$0xff] }
  0x18   :  { %v117_v33 = vpack.c.bf16 %v85_v31, %v84_v30 }
  0x1a   :  { %1258 = vmatmul.mubr.msk.bf16.gmra.mrb[8].mxu0 %vm130_vm0, %v91_v40  ;;  %1290 = vmatmul.mubr.msk.bf16.gmra.mrb[8].mxu1 %vm130_vm0, %v107_v41 }
  0x1b   :  { %1261 = vmatprep.mubr.msk.bf16.mxu0 %vm130_vm0, %v92_v42  ;;  %1293 = vmatprep.mubr.msk.bf16.mxu1 %vm130_vm0, %v108_v43 }
  0x22   :  { %1262 = vmatmul.mubr.msk.bf16.gmra.mrb[12].mxu0 %vm130_vm0, %v93_v52  ;;  %1294 = vmatmul.mubr.msk.bf16.gmra.mrb[12].mxu1 %vm130_vm0, %v109_v53 }
  0x23   :  { %1265 = vmatprep.mubr.msk.bf16.mxu0 %vm130_vm0, %v94_v54  ;;  %1297 = vmatprep.mubr.msk.bf16.mxu1 %vm130_vm0, %v110_v55 }
  0x2a   :  { %1266 = vmatmul.mubr.msk.bf16.gmra.mrb[16].mxu0 %vm130_vm0, %v95_v0  ;;  %1298 = vmatmul.mubr.msk.bf16.gmra.mrb[16].mxu1 %vm130_vm0, %v111_v1 }
  0x2b   :  { %1269 = vmatprep.mubr.msk.bf16.mxu0 %vm130_vm0, %v96_v2  ;;  %1301 = vmatprep.mubr.msk.bf16.mxu1 %vm130_vm0, %v112_v3 }
  0x32   :  { %1270 = vmatmul.mubr.msk.bf16.gmra.mrb[20].mxu0 %vm130_vm0, %v97_v12  ;;  %1302 = vmatmul.mubr.msk.bf16.gmra.mrb[20].mxu1 %vm130_vm0, %v113_v13 }
  0x33   :  { %1273 = vmatprep.mubr.msk.bf16.mxu0 %vm130_vm0, %v98_v14  ;;  %1305 = vmatprep.mubr.msk.bf16.mxu1 %vm130_vm0, %v114_v15 }
  0x3a   :  { %1274 = vmatmul.mubr.msk.bf16.gmra.mrb[24].mxu0 %vm130_vm0, %v99_v24  ;;  %1306 = vmatmul.mubr.msk.bf16.gmra.mrb[24].mxu1 %vm130_vm0, %v115_v25 }
  0x3b   :  { %1277 = vmatprep.mubr.msk.bf16.mxu0 %vm130_vm0, %v100_v26  ;;  %1309 = vmatprep.mubr.msk.bf16.mxu1 %vm130_vm0, %v116_v27 }
  0x42   :  { %1278 = vmatmul.mubr.msk.bf16.gmra.mrb[28].mxu0 %vm130_vm0, %v101_v32  ;;  %1310 = vmatmul.mubr.msk.bf16.gmra.mrb[28].mxu1 %vm130_vm0, %v117_v33 }
  0xdd   :  { %v1251_v35 = vpop.f32.mrb[0].mxu0  ;;  %v1283_v37 = vpop.f32.mrb[0].mxu1 }
  0xde   :  { %v525_v38 = vmul.f32 %v1251_v35, %v1835_v34  ;;  %v557_v39 = vmul.f32 %v1283_v37, %v1835_v34  ;;  %v261_v40 = vpop.f32.mrb[1].mxu0  ;;  %v389_v41 = vpop.f32.mrb[1].mxu1 }
  0xdf   :  { %v523_v42 = vmul.f32 %v1835_v34, %v261_v40  ;;  %v555_v43 = vmul.f32 %v1835_v34, %v389_v41  ;;  %v1252_v44 = vpop.f32.mrb[2].mxu0  ;;  %v1284_v45 = vpop.f32.mrb[2].mxu1 }
  0xe0   :  { %v1847_v46 = vadd.f32 %v1840_v36, %v525_v38  ;;  %v1850_v47 = vadd.f32 %v1840_v36, %v557_v39  ;;  %v526_v48 = vmul.f32 %v1252_v44, %v1835_v34  ;;  %v558_v49 = vmul.f32 %v1284_v45, %v1835_v34  ;;  %v264_v50 = vpop.f32.mrb[3].mxu0  ;;  %v392_v51 = vpop.f32.mrb[3].mxu1 }
  0xe1   :  { %v1855_v52 = vadd.f32 %v1840_v36, %v523_v42  ;;  %v1858_v53 = vadd.f32 %v1840_v36, %v555_v43  ;;  %v524_v54 = vmul.f32 %v1835_v34, %v264_v50  ;;  %v556_v55 = vmul.f32 %v1835_v34, %v392_v51 }
  0xe2   :  { %v660_v56 = vsub.f32 0.0, %v1847_v46  ;;  %v692_v57 = vsub.f32 0.0, %v1850_v47  ;;  %v1865_v58 = vadd.f32 %v1840_v36, %v526_v48  ;;  %v1868_v59 = vadd.f32 %v1840_v36, %v558_v49 }
  0xe3   :  { %v658_v60 = vsub.f32 0.0, %v1855_v52  ;;  %v690_v61 = vsub.f32 0.0, %v1858_v53  ;;  %v1873_v62 = vadd.f32 %v1840_v36, %v524_v54  ;;  %v1876_v63 = vadd.f32 %v1840_v36, %v556_v55 }
  0xe4   :  { %v726_v0 = vmul.f32 1.442695, %v660_v56  ;;  %v790_v1 = vmul.f32 1.442695, %v692_v57  ;;  %v661_v2 = vsub.f32 0.0, %v1865_v58  ;;  %v693_v3 = vsub.f32 0.0, %v1868_v59 }
  0xe5   :  { %v722_v4 = vmul.f32 1.442695, %v658_v60  ;;  %v786_v5 = vmul.f32 1.442695, %v690_v61  ;;  %v659_v6 = vsub.f32 0.0, %v1873_v62  ;;  %v691_v7 = vsub.f32 0.0, %v1876_v63 }
  0xe6   :  { %1319 = vpow2.f32 %v726_v0  ;;  %v728_v8 = vmul.f32 1.442695, %v661_v2  ;;  %v792_v9 = vmul.f32 1.442695, %v693_v3  ;;  %v1255_v10 = vpop.f32.mrb[4].mxu0  ;;  %v1287_v11 = vpop.f32.mrb[4].mxu1 }
  0xe7   :  { %1321 = vpow2.f32 %v790_v1  ;;  %v724_v12 = vmul.f32 1.442695, %v659_v6  ;;  %v788_v13 = vmul.f32 1.442695, %v691_v7  ;;  %v529_v14 = vmul.f32 %v1255_v10, %v1835_v34  ;;  %v277_v15 = vpop.f32.mrb[5].mxu0  ;;  %v405_v16 = vpop.f32.mrb[5].mxu1 }
  0xe8   :  { %1323 = vpow2.f32 %v722_v4  ;;  %v561_v17 = vmul.f32 %v1287_v11, %v1835_v34  ;;  %v527_v18 = vmul.f32 %v1835_v34, %v277_v15  ;;  %v559_v19 = vmul.f32 %v1835_v34, %v405_v16  ;;  %v1256_v20 = vpop.f32.mrb[6].mxu0  ;;  %v1288_v21 = vpop.f32.mrb[6].mxu1 }
  0xe9   :  { %1325 = vpow2.f32 %v786_v5  ;;  %v1887_v22 = vadd.f32 %v1840_v36, %v529_v14  ;;  %v530_v23 = vmul.f32 %v1256_v20, %v1835_v34  ;;  %v562_v24 = vmul.f32 %v1288_v21, %v1835_v34  ;;  %v280_v25 = vpop.f32.mrb[7].mxu0  ;;  %v408_v26 = vpop.f32.mrb[7].mxu1 }
  0xea   :  { %1327 = vpow2.f32 %v728_v8  ;;  %v1892_v27 = vadd.f32 %v1840_v36, %v561_v17  ;;  %v1895_v28 = vadd.f32 %v1840_v36, %v527_v18  ;;  %v1898_v29 = vadd.f32 %v1840_v36, %v559_v19 }
  0xeb   :  { %1329 = vpow2.f32 %v792_v9  ;;  %v664_v30 = vsub.f32 0.0, %v1887_v22  ;;  %v1902_v31 = vadd.f32 %v1840_v36, %v530_v23  ;;  %v1905_v32 = vadd.f32 %v1840_v36, %v562_v24 }
  0xec   :  { %1331 = vpow2.f32 %v724_v12  ;;  %v696_v33 = vsub.f32 0.0, %v1892_v27  ;;  %v662_v35 = vsub.f32 0.0, %v1895_v28  ;;  %v694_v37 = vsub.f32 0.0, %v1898_v29 }
  0xed   :  { %1333 = vpow2.f32 %v788_v13  ;;  %v734_v38 = vmul.f32 1.442695, %v664_v30  ;;  %v665_v39 = vsub.f32 0.0, %v1902_v31  ;;  %v697_v40 = vsub.f32 0.0, %v1905_v32  ;;  %v1259_v41 = vpop.f32.mrb[8].mxu0  ;;  %v1291_v42 = vpop.f32.mrb[8].mxu1 }
  0xee   :  { %v798_v43 = vmul.f32 1.442695, %v696_v33  ;;  %v730_v44 = vmul.f32 1.442695, %v662_v35  ;;  %v794_v45 = vmul.f32 1.442695, %v694_v37  ;;  %v528_v48 = vmul.f32 %v1835_v34, %v280_v25 }
  0xef   :  { %1335 = vpow2.f32 %v734_v38  ;;  %v1913_v49 = vmul.f32 1.442695, %v665_v39  ;;  %v1915_v50 = vmul.f32 1.442695, %v697_v40  ;;  %v560_v51 = vmul.f32 %v1835_v34, %v408_v26  ;;  %v293_v54 = vpop.f32.mrb[9].mxu0  ;;  %v421_v55 = vpop.f32.mrb[9].mxu1 }
  0xf0   :  { %v1320_v56 = vpop.eup %1319  ;;  %1337 = vpow2.f32 %v798_v43  ;;  %v1919_v57 = vadd.f32 %v1840_v36, %v528_v48  ;;  %v533_v60 = vmul.f32 %v1259_v41, %v1835_v34  ;;  %v565_v61 = vmul.f32 %v1291_v42, %v1835_v34  ;;  %v1260_v0 = vpop.f32.mrb[10].mxu0 }
  0xf1   :  { %v1292_v1 = vpop.f32.mrb[10].mxu1  ;;  %v1322_v2 = vpop.eup %1321  ;;  %v852_v3 = vadd.f32 1.0, %v1320_v56  ;;  %1339 = vpow2.f32 %v730_v44  ;;  %v1924_v4 = vadd.f32 %v1840_v36, %v560_v51  ;;  %v531_v5 = vmul.f32 %v1835_v34, %v293_v54 }
  0xf2   :  { %v296_v6 = vpop.f32.mrb[11].mxu0  ;;  %v1927_v7 = vpop.f32.mrb[11].mxu1  ;;  %v884_v9 = vadd.f32 1.0, %v1322_v2  ;;  %1341 = vpow2.f32 %v794_v45  ;;  %v663_v10 = vsub.f32 0.0, %v1919_v57  ;;  %v1931_v11 = vadd.f32 %v1840_v36, %v533_v60 }
  0xf3   :  { %v1324_v8 = vpop.eup %1323  ;;  %1343 = vrcp.f32 %v852_v3  ;;  %v695_v14 = vsub.f32 0.0, %v1924_v4  ;;  %v1935_v15 = vadd.f32 %v1840_v36, %v565_v61  ;;  %v1950_v37 = vadd.f32 %v1840_v36, %v531_v5 }
  0xf4   :  { %v1326_v12 = vpop.eup %1325  ;;  %v850_v13 = vadd.f32 1.0, %v1324_v8  ;;  %1345 = vrcp.f32 %v884_v9  ;;  %v1937_v18 = vmul.f32 1.442695, %v663_v10  ;;  %v668_v19 = vsub.f32 0.0, %v1931_v11 }
  0xf5   :  { %v1328_v16 = vpop.eup %1327  ;;  %v882_v17 = vadd.f32 1.0, %v1326_v12  ;;  %v1940_v23 = vmul.f32 1.442695, %v695_v14  ;;  %v700_v24 = vsub.f32 0.0, %v1935_v15  ;;  %v1943_v25 = vpop.f32.mrb[12].mxu0  ;;  %v563_v43 = vmul.f32 %v1835_v34, %v421_v55 }
  0xf6   :  { %v1330_v20 = vpop.eup %1329  ;;  %1347 = vrcp.f32 %v850_v13  ;;  %v853_v21 = vadd.f32 1.0, %v1328_v16  ;;  %v1945_v26 = vpop.f32.mrb[12].mxu1  ;;  %v1947_v35 = vmul.f32 1.442695, %v668_v19  ;;  %v666_v51 = vsub.f32 0.0, %v1950_v37 }
  0xf7   :  { %v1332_v30 = vpop.eup %1331  ;;  %1349 = vrcp.f32 %v882_v17  ;;  %v885_v33 = vadd.f32 1.0, %v1330_v20  ;;  %v1952_v38 = vpop.f32.mrb[13].mxu0  ;;  %v1956_v42 = vmul.f32 1.442695, %v700_v24  ;;  %v534_v54 = vmul.f32 %v1260_v0, %v1835_v34 }
  0xf8   :  { %v1954_v39 = vpop.f32.mrb[13].mxu1  ;;  %v1334_v40 = vpop.eup %1333  ;;  %1351 = vrcp.f32 %v853_v21  ;;  %v851_v41 = vadd.f32 1.0, %v1332_v30  ;;  %v1970_v2 = vadd.f32 %v1840_v36, %v563_v43  ;;  %v566_v55 = vmul.f32 %v1292_v1, %v1835_v34 }
  0xf9   :  { %v1959_v44 = vpop.f32.mrb[14].mxu0  ;;  %v1961_v45 = vpop.f32.mrb[14].mxu1  ;;  %1353 = vrcp.f32 %v885_v33  ;;  %v883_v48 = vadd.f32 1.0, %v1334_v40  ;;  %v532_v3 = vmul.f32 %v1835_v34, %v296_v6  ;;  %v1974_v9 = vmul.f32 1.442695, %v666_v51 }
  0xfa   :  { %v1965_v56 = vpop.f32.mrb[15].mxu0  ;;  %v1967_v60 = vpop.f32.mrb[15].mxu1  ;;  %1355 = vrcp.f32 %v851_v41  ;;  %v1977_v0 = vadd.f32 %v1840_v36, %v534_v54  ;;  %v698_v13 = vsub.f32 0.0, %v1970_v2  ;;  %v1982_v14 = vadd.f32 %v1840_v36, %v566_v55 }
  0xfb   :  { %v1336_v61 = vpop.eup %1335  ;;  %1357 = vrcp.f32 %v883_v48  ;;  %v1986_v17 = vadd.f32 %v1840_v36, %v532_v3  ;;  %v564_v3 = vmul.f32 %v1835_v34, %v1927_v7 }
  0xfc   :  { %v1338_v5 = vpop.eup %1337  ;;  %v856_v8 = vadd.f32 1.0, %v1336_v61  ;;  %1359 = vpow2.f32 %v1913_v49  ;;  %v669_v16 = vsub.f32 0.0, %v1977_v0  ;;  %v802_v21 = vmul.f32 1.442695, %v698_v13 }
  0xfd   :  { %v1340_v10 = vpop.eup %1339  ;;  %v888_v12 = vadd.f32 1.0, %v1338_v5  ;;  %v701_v24 = vsub.f32 0.0, %v1982_v14  ;;  %v1989_v49 = vpop.f32.mrb[16].mxu0  ;;  %v667_v43 = vsub.f32 0.0, %v1986_v17 }
  0xfe   :  { %v1342_v1 = vpop.eup %1341  ;;  %1361 = vrcp.f32 %v856_v8  ;;  %v854_v6 = vadd.f32 1.0, %v1340_v10  ;;  %v1991_v30 = vpop.f32.mrb[16].mxu1  ;;  %v744_v41 = vmul.f32 1.442695, %v669_v16 }
  0xff   :  { %v1344_v19 = vpop.eup %1343  ;;  %1363 = vrcp.f32 %v888_v12  ;;  %v886_v20 = vadd.f32 1.0, %v1342_v1  ;;  %v1995_v48 = vpop.f32.mrb[17].mxu0  ;;  %v2000_v55 = vmul.f32 1.442695, %v701_v24  ;;  %v537_v12 = vmul.f32 %v1943_v25, %v1835_v34 }
 0x100   :  { %v1346_v33 = vpop.eup %1345  ;;  %v1044_v40 = vmul.f32 %v1344_v19, %v1847_v46  ;;  %1365 = vrcp.f32 %v854_v6  ;;  %v1997_v51 = vpop.f32.mrb[17].mxu1 }
 0x101   :  { %v1348_v54 = vpop.eup %1347  ;;  %v1076_v61 = vmul.f32 %v1346_v33, %v1850_v47  ;;  %1367 = vrcp.f32 %v886_v20  ;;  %v2004_v5 = vpop.f32.mrb[18].mxu0  ;;  %v2014_v47 = vmul.f32 1.442695, %v667_v43 }
 0x102   :  { %v2006_v46 = vpop.f32.mrb[18].mxu1  ;;  %v1350_v8 = vpop.eup %1349  ;;  %1109 = vst.msk [vmem:[%s2667_s4 + $0x10] sm:$0xff] %vm1106_vm1, %v1044_v40  ;;  %v1042_v10 = vmul.f32 %v1348_v54, %v1855_v52  ;;  %1369 = vpow2.f32 %v1915_v50  ;;  %v2029_v52 = vadd.f32 %v1840_v36, %v564_v3  ;;  %v569_v50 = vmul.f32 %v1945_v26, %v1835_v34 }
 0x103   :  { %v2018_v7 = vpop.f32.mrb[19].mxu0  ;;  %v2020_v13 = vpop.f32.mrb[19].mxu1  ;;  %1141 = vst.msk [vmem:[%s2667_s4 + $0x110] sm:$0xff] %vm1106_vm1, %v1076_v61  ;;  %v1074_v6 = vmul.f32 %v1350_v8, %v1858_v53  ;;  %1371 = vpow2.f32 %v1937_v18  ;;  %v2040_v53 = vadd.f32 %v1840_v36, %v537_v12  ;;  %v535_v18 = vmul.f32 %v1835_v34, %v1952_v38 }
 0x104   :  { %v1352_v1 = vpop.eup %1351  ;;  %1107 = vst.msk [vmem:[%s2667_s4] sm:$0xff] %vm1106_vm1, %v1042_v10  ;;  %1373 = vpow2.f32 %v1940_v23  ;;  %v2052_v23 = vadd.f32 %v1840_v36, %v569_v50 }
 0x105   :  { %v1354_v25 = vpop.eup %1353  ;;  %v1045_v16 = vmul.f32 %v1352_v1, %v1865_v58  ;;  %1139 = vst.msk [vmem:[%s2667_s4 + $0x100] sm:$0xff] %vm1106_vm1, %v1074_v6  ;;  %1375 = vpow2.f32 %v1947_v35  ;;  %v699_v58 = vsub.f32 0.0, %v2029_v52  ;;  %v672_v24 = vsub.f32 0.0, %v2040_v53  ;;  %v2071_v43 = vpop.f32.mrb[20].mxu0 }
 0x106   :  { %v1356_v19 = vpop.eup %1355  ;;  %v1077_v26 = vmul.f32 %v1354_v25, %v1868_v59  ;;  %1377 = vpow2.f32 %v1956_v42  ;;  %v2062_v59 = vadd.f32 %v1840_v36, %v535_v18  ;;  %v2073_v42 = vpop.f32.mrb[20].mxu1 }
 0x107   :  { %v1358_v20 = vpop.eup %1357  ;;  %1110 = vst.msk [vmem:[%s2667_s4 + $0x18] sm:$0xff] %vm1106_vm1, %v1045_v16  ;;  %v1043_v38 = vmul.f32 %v1356_v19, %v1873_v62  ;;  %1379 = vpow2.f32 %v1974_v9  ;;  %v804_v40 = vmul.f32 1.442695, %v699_v58  ;;  %v704_v62 = vsub.f32 0.0, %v2052_v23  ;;  %v2080_v8 = vpop.f32.mrb[21].mxu0 }
 0x108   :  { %v1360_v35 = vpop.eup %1359  ;;  %1142 = vst.msk [vmem:[%s2667_s4 + $0x118] sm:$0xff] %vm1106_vm1, %v1077_v26  ;;  %v1075_v33 = vmul.f32 %v1358_v20, %v1876_v63  ;;  %1381 = vpow2.f32 %v802_v21  ;;  %v750_v3 = vmul.f32 1.442695, %v672_v24  ;;  %v670_v63 = vsub.f32 0.0, %v2062_v59  ;;  %v2082_v9 = vpop.f32.mrb[21].mxu1 }
 0x109   :  { %v1362_v54 = vpop.eup %1361  ;;  %1108 = vst.msk [vmem:[%s2667_s4 + $0x8] sm:$0xff] %vm1106_vm1, %v1043_v38  ;;  %v857_v61 = vadd.f32 1.0, %v1360_v35  ;;  %1383 = vpow2.f32 %v744_v41  ;;  %v2089_v1 = vmul.f32 1.442695, %v704_v62  ;;  %v567_v21 = vmul.f32 %v1835_v34, %v1954_v39  ;;  %v2093_v6 = vpop.f32.mrb[22].mxu0 }
 0x10a   :  { %v1364_v10 = vpop.eup %1363  ;;  %1140 = vst.msk [vmem:[%s2667_s4 + $0x108] sm:$0xff] %vm1106_vm1, %v1075_v33  ;;  %v1048_v12 = vmul.f32 %v1362_v54, %v1887_v22  ;;  %v2095_v50 = vpop.f32.mrb[22].mxu1  ;;  %v2098_v18 = vmul.f32 1.442695, %v670_v63  ;;  %v538_v19 = vmul.f32 %v1959_v44, %v1835_v34  ;;  %v570_v44 = vmul.f32 %v1961_v45, %v1835_v34 }
 0x10b   :  { %v1366_v25 = vpop.eup %1365  ;;  %v1080_v16 = vmul.f32 %v1364_v10, %v1892_v27  ;;  %1385 = vrcp.f32 %v857_v61  ;;  %v2102_v22 = vpop.f32.mrb[23].mxu0  ;;  %v2113_v27 = vadd.f32 %v1840_v36, %v567_v21 }
 0x10c   :  { %v2104_v41 = vpop.f32.mrb[23].mxu1  ;;  %v1368_v26 = vpop.eup %1367  ;;  %1113 = vst.msk [vmem:[%s2667_s4 + $0x30] sm:$0xff] %vm1106_vm1, %v1048_v12  ;;  %v1046_v39 = vmul.f32 %v1366_v25, %v1895_v28  ;;  %1387 = vpow2.f32 %v2000_v55  ;;  %v2124_v28 = vadd.f32 %v1840_v36, %v538_v19  ;;  %v536_v55 = vmul.f32 %v1835_v34, %v1965_v56 }
 0x10d   :  { %v1370_v58 = vpop.eup %1369  ;;  %1145 = vst.msk [vmem:[%s2667_s4 + $0x130] sm:$0xff] %vm1106_vm1, %v1080_v16  ;;  %v1078_v20 = vmul.f32 %v1368_v26, %v1898_v29  ;;  %1389 = vpow2.f32 %v2014_v47  ;;  %v702_v24 = vsub.f32 0.0, %v2113_v27  ;;  %v2134_v29 = vadd.f32 %v1840_v36, %v570_v44  ;;  %v2147_v63 = vpop.f32.mrb[24].mxu0 }
 0x10e   :  { %v1372_v38 = vpop.eup %1371  ;;  %1111 = vst.msk [vmem:[%s2667_s4 + $0x20] sm:$0xff] %vm1106_vm1, %v1046_v39  ;;  %v889_v45 = vadd.f32 1.0, %v1370_v58  ;;  %1391 = vpow2.f32 %v804_v40  ;;  %v673_v35 = vsub.f32 0.0, %v2124_v28  ;;  %v2142_v33 = vadd.f32 %v1840_v36, %v536_v55  ;;  %v2149_v10 = vpop.f32.mrb[24].mxu1 }
 0x10f   :  { %v1374_v47 = vpop.eup %1373  ;;  %1143 = vst.msk [vmem:[%s2667_s4 + $0x120] sm:$0xff] %vm1106_vm1, %v1078_v20  ;;  %v855_v56 = vadd.f32 1.0, %v1372_v38  ;;  %1393 = vpow2.f32 %v750_v3  ;;  %v2144_v54 = vmul.f32 1.442695, %v702_v24  ;;  %v705_v61 = vsub.f32 0.0, %v2134_v29  ;;  %v2154_v16 = vpop.f32.mrb[25].mxu0 }
 0x110   :  { %v1376_v62 = vpop.eup %1375  ;;  %1395 = vrcp.f32 %v889_v45  ;;  %v887_v40 = vadd.f32 1.0, %v1374_v47  ;;  %v2151_v3 = vmul.f32 1.442695, %v673_v35  ;;  %v671_v25 = vsub.f32 0.0, %v2142_v33  ;;  %v2156_v19 = vpop.f32.mrb[25].mxu1 }
 0x111   :  { %v1378_v12 = vpop.eup %1377  ;;  %1397 = vrcp.f32 %v855_v56  ;;  %v860_v21 = vadd.f32 1.0, %v1376_v62  ;;  %v2158_v44 = vmul.f32 1.442695, %v705_v61  ;;  %v568_v58 = vmul.f32 %v1835_v34, %v1967_v60  ;;  %v2162_v20 = vpop.f32.mrb[26].mxu0 }
 0x112   :  { %v1380_v26 = vpop.eup %1379  ;;  %1399 = vrcp.f32 %v887_v40  ;;  %v892_v39 = vadd.f32 1.0, %v1378_v12  ;;  %2668 = vst [vmem:[#allocation2_spill] sm:$0xff] %v2162_v20  ;;  %v2164_v55 = vpop.f32.mrb[26].mxu1  ;;  %v2166_v24 = vmul.f32 1.442695, %v671_v25  ;;  %v541_v47 = vmul.f32 %v1989_v49, %v1835_v34 }
 0x113   :  { %2669 = vst [vmem:[#allocation3_spill] sm:$0xff] %v2164_v55  ;;  %v1382_v38 = vpop.eup %1381  ;;  %1401 = vrcp.f32 %v860_v21  ;;  %v858_v45 = vadd.f32 1.0, %v1380_v26  ;;  %v2170_v56 = vpop.f32.mrb[27].mxu0  ;;  %v2175_v60 = vadd.f32 %v1840_v36, %v568_v58  ;;  %v573_v61 = vmul.f32 %v1991_v30, %v1835_v34 }
 0x114   :  { %2670 = vst [vmem:[#allocation4_spill] sm:$0xff] %v2170_v56  ;;  %v2172_v35 = vpop.f32.mrb[27].mxu1  ;;  %v1384_v62 = vpop.eup %1383  ;;  %1403 = vrcp.f32 %v892_v39  ;;  %v890_v40 = vadd.f32 1.0, %v1382_v38  ;;  %v2180_v25 = vadd.f32 %v1840_v36, %v541_v47  ;;  %v539_v49 = vmul.f32 %v1835_v34, %v1995_v48 }
 0x115   :  { %2671 = vst [vmem:[#allocation5_spill] sm:$0xff] %v2172_v35  ;;  %v1386_v12 = vpop.eup %1385  ;;  %1405 = vrcp.f32 %v858_v45  ;;  %v861_v21 = vadd.f32 1.0, %v1384_v62  ;;  %v703_v39 = vsub.f32 0.0, %v2175_v60  ;;  %v2187_v58 = vadd.f32 %v1840_v36, %v573_v61  ;;  %v2199_v61 = vpop.f32.mrb[28].mxu0 }
 0x116   :  { %v1388_v26 = vpop.eup %1387  ;;  %v1049_v35 = vmul.f32 %v1386_v12, %v1902_v31  ;;  %1407 = vrcp.f32 %v890_v40  ;;  %v676_v45 = vsub.f32 0.0, %v2180_v25  ;;  %v2191_v47 = vadd.f32 %v1840_v36, %v539_v49  ;;  %2672 = vst [vmem:[#allocation6_spill] sm:$0xff] %v2199_v61  ;;  %v2201_v12 = vpop.f32.mrb[28].mxu1 }
 0x117   :  { %v1390_v38 = vpop.eup %1389  ;;  %1409 = vrcp.f32 %v861_v21  ;;  %v893_v30 = vadd.f32 1.0, %v1388_v26  ;;  %v812_v48 = vmul.f32 1.442695, %v703_v39  ;;  %v708_v40 = vsub.f32 0.0, %v2187_v58  ;;  %2673 = vst [vmem:[#allocation7_spill] sm:$0xff] %v2201_v12  ;;  %v2203_v56 = vpop.f32.mrb[29].mxu0 }
 0x118   :  { %v1392_v62 = vpop.eup %1391  ;;  %1114 = vst.msk [vmem:[%s2667_s4 + $0x38] sm:$0xff] %vm1106_vm1, %v1049_v35  ;;  %v859_v31 = vadd.f32 1.0, %v1390_v38  ;;  %1411 = vpow2.f32 %v2089_v1  ;;  %v758_v26 = vmul.f32 1.442695, %v676_v45  ;;  %2674 = vst [vmem:[#allocation8_spill] sm:$0xff] %v2203_v56  ;;  %v2205_v55 = vpop.f32.mrb[29].mxu1  ;;  %v571_v39 = vmul.f32 %v1835_v34, %v1997_v51 }
 0x119   :  { %v1394_v21 = vpop.eup %1393  ;;  %1413 = vrcp.f32 %v893_v30  ;;  %v891_v49 = vadd.f32 1.0, %v1392_v62  ;;  %2675 = vst [vmem:[#allocation9_spill] sm:$0xff] %v2205_v55  ;;  %v674_v1 = vsub.f32 0.0, %v2191_v47  ;;  %v2210_v38 = vpop.f32.mrb[30].mxu0  ;;  %v822_v45 = vmul.f32 1.442695, %v708_v40 }
 0x11a   :  { %v1396_v20 = vpop.eup %1395  ;;  %1415 = vrcp.f32 %v859_v31  ;;  %v864_v35 = vadd.f32 1.0, %v1394_v21  ;;  %v2212_v61 = vpop.f32.mrb[30].mxu1  ;;  %v542_v62 = vmul.f32 %v2004_v5, %v1835_v34  ;;  %v2223_v51 = vadd.f32 %v1840_v36, %v571_v39 }
 0x11b   :  { %2676 = vst [vmem:[#allocation10_spill] sm:$0xff] %v2212_v61  ;;  %v1398_v12 = vpop.eup %1397  ;;  %v1081_v30 = vmul.f32 %v1396_v20, %v1905_v32  ;;  %1417 = vrcp.f32 %v891_v49  ;;  %v2217_v55 = vpop.f32.mrb[31].mxu0  ;;  %v574_v61 = vmul.f32 %v2006_v46, %v1835_v34  ;;  %v754_v49 = vmul.f32 1.442695, %v674_v1 }
 0x11c   :  { %v2219_v31 = vpop.f32.mrb[31].mxu1  ;;  %v1400_v21 = vpop.eup %1399  ;;  %v1047_v56 = vmul.f32 %v1398_v12, %v1919_v57  ;;  %1419 = vrcp.f32 %v864_v35  ;;  %v2234_v20 = vadd.f32 %v1840_v36, %v542_v62  ;;  %v540_v57 = vmul.f32 %v1835_v34, %v2018_v7 }
 0x11d   :  { %v1402_v32 = vpop.eup %1401  ;;  %1146 = vst.msk [vmem:[%s2667_s4 + $0x138] sm:$0xff] %vm1106_vm1, %v1081_v30  ;;  %v1079_v5 = vmul.f32 %v1400_v21, %v1924_v4  ;;  %1421 = vpow2.f32 %v2098_v18  ;;  %v706_v4 = vsub.f32 0.0, %v2223_v51  ;;  %v2246_v18 = vadd.f32 %v1840_v36, %v574_v61 }
 0x11e   :  { %v1404_v40 = vpop.eup %1403  ;;  %1112 = vst.msk [vmem:[%s2667_s4 + $0x28] sm:$0xff] %vm1106_vm1, %v1047_v56  ;;  %v1052_v46 = vmul.f32 %v1402_v32, %v1931_v11  ;;  %1423 = vpow2.f32 %v2144_v54  ;;  %v677_v56 = vsub.f32 0.0, %v2234_v20  ;;  %v2256_v11 = vadd.f32 %v1840_v36, %v540_v57 }
 0x11f   :  { %v1406_v12 = vpop.eup %1405  ;;  %1144 = vst.msk [vmem:[%s2667_s4 + $0x128] sm:$0xff] %vm1106_vm1, %v1079_v5  ;;  %v1084_v7 = vmul.f32 %v1404_v40, %v1935_v15  ;;  %1425 = vpow2.f32 %v2151_v3  ;;  %v709_v15 = vsub.f32 0.0, %v2246_v18  ;;  %v818_v39 = vmul.f32 1.442695, %v706_v4 }
 0x120   :  { %v1408_v54 = vpop.eup %1407  ;;  %1117 = vst.msk [vmem:[%s2667_s4 + $0x50] sm:$0xff] %vm1106_vm1, %v1052_v46  ;;  %v1050_v61 = vmul.f32 %v1406_v12, %v1950_v37  ;;  %1427 = vpow2.f32 %v2158_v44  ;;  %v760_v30 = vmul.f32 1.442695, %v677_v56  ;;  %v675_v44 = vsub.f32 0.0, %v2256_v11 }
 0x121   :  { %v1410_v35 = vpop.eup %1409  ;;  %1149 = vst.msk [vmem:[%s2667_s4 + $0x150] sm:$0xff] %vm1106_vm1, %v1084_v7  ;;  %v1082_v3 = vmul.f32 %v1408_v54, %v1970_v2  ;;  %1429 = vpow2.f32 %v2166_v24  ;;  %v572_v1 = vmul.f32 %v1835_v34, %v2020_v13  ;;  %v824_v24 = vmul.f32 1.442695, %v709_v15 }
 0x122   :  { %v1412_v62 = vpop.eup %1411  ;;  %1115 = vst.msk [vmem:[%s2667_s4 + $0x40] sm:$0xff] %vm1106_vm1, %v1050_v61  ;;  %v1053_v37 = vmul.f32 %v1410_v35, %v1977_v0  ;;  %1431 = vpow2.f32 %v812_v48  ;;  %v545_v32 = vmul.f32 %v2071_v43, %v1835_v34  ;;  %v577_v48 = vmul.f32 %v2073_v42, %v1835_v34 }
 0x123   :  { %v1414_v21 = vpop.eup %1413  ;;  %1147 = vst.msk [vmem:[%s2667_s4 + $0x140] sm:$0xff] %vm1106_vm1, %v1082_v3  ;;  %v896_v2 = vadd.f32 1.0, %v1412_v62  ;;  %1433 = vpow2.f32 %v758_v26  ;;  %v2291_v13 = vadd.f32 %v1840_v36, %v572_v1  ;;  %v543_v40 = vmul.f32 %v1835_v34, %v2080_v8 }
 0x124   :  { %v1416_v5 = vpop.eup %1415  ;;  %1118 = vst.msk [vmem:[%s2667_s4 + $0x58] sm:$0xff] %vm1106_vm1, %v1053_v37  ;;  %v1085_v0 = vmul.f32 %v1414_v21, %v1982_v14  ;;  %1435 = vpow2.f32 %v822_v45  ;;  %v2297_v43 = vadd.f32 %v1840_v36, %v545_v32  ;;  %v756_v7 = vmul.f32 1.442695, %v675_v44 }
 0x125   :  { %v1418_v26 = vpop.eup %1417  ;;  %v1051_v57 = vmul.f32 %v1416_v5, %v1986_v17  ;;  %1437 = vrcp.f32 %v896_v2  ;;  %v707_v42 = vsub.f32 0.0, %v2291_v13  ;;  %v2308_v17 = vadd.f32 %v1840_v36, %v577_v48 }
 0x126   :  { %v1420_v46 = vpop.eup %1419  ;;  %1150 = vst.msk [vmem:[%s2667_s4 + $0x158] sm:$0xff] %vm1106_vm1, %v1085_v0  ;;  %v1083_v14 = vmul.f32 %v1418_v26, %v2029_v52  ;;  %1439 = vpow2.f32 %v754_v49  ;;  %v2316_v4 = vadd.f32 %v1840_v36, %v543_v40  ;;  %v680_v61 = vsub.f32 0.0, %v2297_v43 }
 0x127   :  { %v1422_v45 = vpop.eup %1421  ;;  %1116 = vst.msk [vmem:[%s2667_s4 + $0x48] sm:$0xff] %vm1106_vm1, %v1051_v57  ;;  %v1056_v8 = vmul.f32 %v1420_v46, %v2040_v53  ;;  %1441 = vpow2.f32 %v818_v39  ;;  %v2326_v54 = vmul.f32 1.442695, %v707_v42  ;;  %v712_v35 = vsub.f32 0.0, %v2308_v17 }
 0x128   :  { %v1424_v12 = vpop.eup %1423  ;;  %1148 = vst.msk [vmem:[%s2667_s4 + $0x148] sm:$0xff] %vm1106_vm1, %v1083_v14  ;;  %v862_v52 = vadd.f32 1.0, %v1422_v45  ;;  %1443 = vpow2.f32 %v760_v30  ;;  %v575_v3 = vmul.f32 %v1835_v34, %v2082_v9  ;;  %v678_v62 = vsub.f32 0.0, %v2316_v4 }
 0x129   :  { %v1426_v56 = vpop.eup %1425  ;;  %1121 = vst.msk [vmem:[%s2667_s4 + $0x70] sm:$0xff] %vm1106_vm1, %v1056_v8  ;;  %v894_v53 = vadd.f32 1.0, %v1424_v12  ;;  %1445 = vpow2.f32 %v824_v24  ;;  %v546_v37 = vmul.f32 %v2093_v6, %v1835_v34  ;;  %v578_v2 = vmul.f32 %v2095_v50, %v1835_v34 }
 0x12a   :  { %v1428_v49 = vpop.eup %1427  ;;  %1447 = vrcp.f32 %v862_v52  ;;  %v865_v15 = vadd.f32 1.0, %v1426_v56  ;;  %v2336_v21 = vadd.f32 %v1840_v36, %v575_v3  ;;  %v544_v5 = vmul.f32 %v1835_v34, %v2102_v22 }
 0x12b   :  { %v1430_v39 = vpop.eup %1429  ;;  %1449 = vrcp.f32 %v894_v53  ;;  %v897_v30 = vadd.f32 1.0, %v1428_v49  ;;  %v2341_v32 = vadd.f32 %v1840_v36, %v546_v37  ;;  %v2347_v26 = vadd.f32 %v1840_v36, %v578_v2 }
 0x12c   :  { %v1432_v44 = vpop.eup %1431  ;;  %1451 = vrcp.f32 %v865_v15  ;;  %v863_v1 = vadd.f32 1.0, %v1430_v39  ;;  %v710_v48 = vsub.f32 0.0, %v2336_v21  ;;  %v766_v40 = vmul.f32 1.442695, %v680_v61 }
 0x12d   :  { %v1434_v24 = vpop.eup %1433  ;;  %1453 = vrcp.f32 %v897_v30  ;;  %v895_v9 = vadd.f32 1.0, %v1432_v44  ;;  %v2350_v46 = vadd.f32 %v1840_v36, %v544_v5  ;;  %v830_v22 = vmul.f32 1.442695, %v712_v35 }
 0x12e   :  { %v1436_v0 = vpop.eup %1435  ;;  %1455 = vrcp.f32 %v863_v1  ;;  %v868_v6 = vadd.f32 1.0, %v1434_v24  ;;  %v762_v45 = vmul.f32 1.442695, %v678_v62  ;;  %v826_v52 = vmul.f32 1.442695, %v710_v48 }
 0x12f   :  { %v1438_v57 = vpop.eup %1437  ;;  %1457 = vrcp.f32 %v895_v9  ;;  %v900_v50 = vadd.f32 1.0, %v1436_v0  ;;  %v681_v56 = vsub.f32 0.0, %v2341_v32  ;;  %v713_v49 = vsub.f32 0.0, %v2347_v26 }
 0x130   :  { %v1440_v14 = vpop.eup %1439  ;;  %v1088_v42 = vmul.f32 %v1438_v57, %v2052_v23  ;;  %1459 = vrcp.f32 %v868_v6  ;;  %v576_v23 = vmul.f32 %v1835_v34, %v2104_v41  ;;  %v679_v3 = vsub.f32 0.0, %v2350_v46 }
 0x131   :  { %v1442_v8 = vpop.eup %1441  ;;  %1461 = vrcp.f32 %v900_v50  ;;  %v866_v12 = vadd.f32 1.0, %v1440_v14  ;;  %v549_v39 = vmul.f32 %v2147_v63, %v1835_v34  ;;  %v547_v2 = vmul.f32 %v1835_v34, %v2154_v16  ;;  %v2409_v14 = vld [vmem:[%s2665_s2] ss:$0 sm:$0xff] }
 0x132   :  { %v1444_v53 = vpop.eup %1443  ;;  %1153 = vst.msk [vmem:[%s2667_s4 + $0x170] sm:$0xff] %vm1106_vm1, %v1088_v42  ;;  %v898_v61 = vadd.f32 1.0, %v1442_v8  ;;  %1463 = vpow2.f32 %v756_v7  ;;  %v2365_v37 = vadd.f32 %v1840_v36, %v576_v23  ;;  %v581_v7 = vmul.f32 %v2149_v10, %v1835_v34  ;;  %v2679_v23 = vld [vmem:[#allocation4_spill] sm:$0xff] }
 0x133   :  { %v1446_v15 = vpop.eup %1445  ;;  %1465 = vrcp.f32 %v866_v12  ;;  %v869_v35 = vadd.f32 1.0, %v1444_v53  ;;  %v2371_v1 = vadd.f32 %v1840_v36, %v549_v39  ;;  %v768_v34 = vmul.f32 1.442695, %v681_v56  ;;  %v2678_v53 = vld [vmem:[#allocation3_spill] sm:$0xff] }
 0x134   :  { %v1448_v30 = vpop.eup %1447  ;;  %1467 = vrcp.f32 %v898_v61  ;;  %v901_v62 = vadd.f32 1.0, %v1446_v15  ;;  %v711_v9 = vsub.f32 0.0, %v2365_v37  ;;  %v2378_v5 = vadd.f32 %v1840_v36, %v581_v7 }
 0x135   :  { %v1450_v44 = vpop.eup %1449  ;;  %v1054_v41 = vmul.f32 %v1448_v30, %v2062_v59  ;;  %1469 = vrcp.f32 %v869_v35  ;;  %v2387_v16 = vadd.f32 %v1840_v36, %v547_v2  ;;  %v832_v6 = vmul.f32 1.442695, %v713_v49  ;;  %v2435_v49 = vld [vmem:[%s2666_s3] ss:$0 sm:$0xff] }
 0x136   :  { %v1452_v63 = vpop.eup %1451  ;;  %v1086_v24 = vmul.f32 %v1450_v44, %v2113_v27  ;;  %1471 = vrcp.f32 %v901_v62  ;;  %v684_v48 = vsub.f32 0.0, %v2371_v1  ;;  %v582_v61 = vmul.f32 %v2409_v14, %v2678_v53 }
 0x137   :  { %v1454_v10 = vpop.eup %1453  ;;  %1119 = vst.msk [vmem:[%s2667_s4 + $0x60] sm:$0xff] %vm1106_vm1, %v1054_v41  ;;  %v1057_v59 = vmul.f32 %v1452_v63, %v2124_v28  ;;  %1473 = vpow2.f32 %v2326_v54  ;;  %v764_v28 = vmul.f32 1.442695, %v679_v3  ;;  %v828_v54 = vmul.f32 1.442695, %v711_v9 }
 0x138   :  { %v1456_v27 = vpop.eup %1455  ;;  %1151 = vst.msk [vmem:[%s2667_s4 + $0x160] sm:$0xff] %vm1106_vm1, %v1086_v24  ;;  %v1089_v0 = vmul.f32 %v1454_v10, %v2134_v29  ;;  %1475 = vpow2.f32 %v766_v40  ;;  %v716_v40 = vsub.f32 0.0, %v2378_v5  ;;  %v774_v56 = vmul.f32 1.442695, %v684_v48  ;;  %v2681_v48 = vld [vmem:[#allocation6_spill] sm:$0xff] }
 0x139   :  { %v1458_v57 = vpop.eup %1457  ;;  %1122 = vst.msk [vmem:[%s2667_s4 + $0x78] sm:$0xff] %vm1106_vm1, %v1057_v59  ;;  %v1055_v36 = vmul.f32 %v1456_v27, %v2142_v33  ;;  %1477 = vpow2.f32 %v830_v22  ;;  %v579_v33 = vmul.f32 %v2409_v14, %v2156_v19  ;;  %v548_v15 = vmul.f32 %v2409_v14, %v2679_v23 }
 0x13a   :  { %v1460_v50 = vpop.eup %1459  ;;  %1154 = vst.msk [vmem:[%s2667_s4 + $0x178] sm:$0xff] %vm1106_vm1, %v1089_v0  ;;  %v1087_v29 = vmul.f32 %v1458_v57, %v2175_v60  ;;  %1479 = vpow2.f32 %v762_v45  ;;  %v682_v60 = vsub.f32 0.0, %v2387_v16  ;;  %v2677_v45 = vld [vmem:[#allocation2_spill] sm:$0xff]  ;;  %v838_v39 = vmul.f32 1.442695, %v716_v40 }
 0x13b   :  { %v1462_v42 = vpop.eup %1461  ;;  %1120 = vst.msk [vmem:[%s2667_s4 + $0x68] sm:$0xff] %vm1106_vm1, %v1055_v36  ;;  %v1060_v22 = vmul.f32 %v1460_v50, %v2180_v25  ;;  %1481 = vpow2.f32 %v826_v52  ;;  %v550_v8 = vmul.f32 %v2409_v14, %v2677_v45  ;;  %v2452_v41 = vadd.f32 %v2435_v49, %v582_v61  ;;  %v2682_v50 = vld [vmem:[#allocation7_spill] sm:$0xff] }
 0x13c   :  { %v1464_v12 = vpop.eup %1463  ;;  %1152 = vst.msk [vmem:[%s2667_s4 + $0x168] sm:$0xff] %vm1106_vm1, %v1087_v29  ;;  %v1092_v19 = vmul.f32 %v1462_v42, %v2187_v58  ;;  %1483 = vpow2.f32 %v768_v34  ;;  %v2438_v58 = vadd.f32 %v2435_v49, %v579_v33  ;;  %v770_v44 = vmul.f32 1.442695, %v682_v60  ;;  %v2680_v34 = vld [vmem:[#allocation5_spill] sm:$0xff] }
 0x13d   :  { %v1466_v25 = vpop.eup %1465  ;;  %1125 = vst.msk [vmem:[%s2667_s4 + $0x90] sm:$0xff] %vm1106_vm1, %v1060_v22  ;;  %v867_v52 = vadd.f32 1.0, %v1464_v12  ;;  %1485 = vpow2.f32 %v832_v6  ;;  %v2448_v30 = vadd.f32 %v2435_v49, %v550_v8  ;;  %v2460_v63 = vadd.f32 %v2435_v49, %v548_v15  ;;  %v2683_v22 = vld [vmem:[#allocation8_spill] sm:$0xff] }
 0x13e   :  { %v1468_v35 = vpop.eup %1467  ;;  %1157 = vst.msk [vmem:[%s2667_s4 + $0x190] sm:$0xff] %vm1106_vm1, %v1092_v19  ;;  %v1058_v3 = vmul.f32 %v1466_v25, %v2191_v47  ;;  %1487 = vpow2.f32 %v764_v28  ;;  %v714_v9 = vsub.f32 0.0, %v2438_v58  ;;  %v580_v27 = vmul.f32 %v2409_v14, %v2680_v34 }
 0x13f   :  { %v1470_v62 = vpop.eup %1469  ;;  %v1090_v7 = vmul.f32 %v1468_v35, %v2223_v51  ;;  %1489 = vrcp.f32 %v867_v52  ;;  %v685_v59 = vsub.f32 0.0, %v2448_v30  ;;  %v717_v6 = vsub.f32 0.0, %v2452_v41 }
 0x140   :  { %v1472_v2 = vpop.eup %1471  ;;  %1123 = vst.msk [vmem:[%s2667_s4 + $0x80] sm:$0xff] %vm1106_vm1, %v1058_v3  ;;  %v1061_v47 = vmul.f32 %v1470_v62, %v2234_v20  ;;  %1491 = vpow2.f32 %v828_v54  ;;  %v553_v57 = vmul.f32 %v2409_v14, %v2681_v48  ;;  %v683_v54 = vsub.f32 0.0, %v2460_v63 }
 0x141   :  { %v1474_v24 = vpop.eup %1473  ;;  %1155 = vst.msk [vmem:[%s2667_s4 + $0x180] sm:$0xff] %vm1106_vm1, %v1090_v7  ;;  %v1093_v51 = vmul.f32 %v1472_v2, %v2246_v18  ;;  %1493 = vpow2.f32 %v774_v56  ;;  %v585_v29 = vmul.f32 %v2409_v14, %v2682_v50  ;;  %v2486_v42 = vadd.f32 %v2435_v49, %v580_v27 }
 0x142   :  { %v1476_v10 = vpop.eup %1475  ;;  %1126 = vst.msk [vmem:[%s2667_s4 + $0x98] sm:$0xff] %vm1106_vm1, %v1061_v47  ;;  %v899_v20 = vadd.f32 1.0, %v1474_v24  ;;  %1495 = vpow2.f32 %v838_v39  ;;  %v551_v60 = vmul.f32 %v2409_v14, %v2683_v22  ;;  %v834_v12 = vmul.f32 1.442695, %v714_v9  ;;  %v2684_v24 = vld [vmem:[#allocation9_spill] sm:$0xff] }
 0x143   :  { %v1478_v0 = vpop.eup %1477  ;;  %1158 = vst.msk [vmem:[%s2667_s4 + $0x198] sm:$0xff] %vm1106_vm1, %v1093_v51  ;;  %v872_v18 = vadd.f32 1.0, %v1476_v10  ;;  %1497 = vpow2.f32 %v770_v44  ;;  %v2491_v19 = vadd.f32 %v2435_v49, %v553_v57  ;;  %v776_v61 = vmul.f32 1.442695, %v685_v59 }
 0x144   :  { %v1480_v36 = vpop.eup %1479  ;;  %1499 = vrcp.f32 %v899_v20  ;;  %v904_v28 = vadd.f32 1.0, %v1478_v0  ;;  %v2494_v25 = vadd.f32 %v2435_v49, %v585_v29  ;;  %v840_v15 = vmul.f32 1.442695, %v717_v6  ;;  %v2685_v0 = vld [vmem:[#allocation10_spill] sm:$0xff] }
 0x145   :  { %v1482_v40 = vpop.eup %1481  ;;  %1501 = vrcp.f32 %v872_v18  ;;  %v870_v33 = vadd.f32 1.0, %v1480_v36  ;;  %v772_v35 = vmul.f32 1.442695, %v683_v54  ;;  %v715_v62 = vsub.f32 0.0, %v2486_v42 }
 0x146   :  { %v1484_v45 = vpop.eup %1483  ;;  %1503 = vrcp.f32 %v904_v28  ;;  %v902_v8 = vadd.f32 1.0, %v1482_v40  ;;  %v2498_v7 = vadd.f32 %v2435_v49, %v551_v60  ;;  %v688_v47 = vsub.f32 0.0, %v2491_v19 }
 0x147   :  { %v1486_v56 = vpop.eup %1485  ;;  %1505 = vrcp.f32 %v870_v33  ;;  %v873_v53 = vadd.f32 1.0, %v1484_v45  ;;  %v583_v51 = vmul.f32 %v2409_v14, %v2684_v24  ;;  %v720_v20 = vsub.f32 0.0, %v2494_v25 }
 0x148   :  { %v1488_v52 = vpop.eup %1487  ;;  %1507 = vrcp.f32 %v902_v8  ;;  %v905_v23 = vadd.f32 1.0, %v1486_v56  ;;  %v554_v59 = vmul.f32 %v2409_v14, %v2210_v38  ;;  %v586_v18 = vmul.f32 %v2409_v14, %v2685_v0 }
 0x149   :  { %v1490_v3 = vpop.eup %1489  ;;  %1509 = vrcp.f32 %v873_v53  ;;  %v871_v39 = vadd.f32 1.0, %v1488_v52  ;;  %v2512_v27 = vadd.f32 %v2435_v49, %v583_v51  ;;  %v686_v57 = vsub.f32 0.0, %v2498_v7 }
 0x14a   :  { %v1492_v44 = vpop.eup %1491  ;;  %v1059_v2 = vmul.f32 %v1490_v3, %v2256_v11  ;;  %1511 = vrcp.f32 %v905_v23  ;;  %v552_v38 = vmul.f32 %v2409_v14, %v2217_v55  ;;  %v836_v54 = vmul.f32 1.442695, %v715_v62 }
 0x14b   :  { %v1494_v9 = vpop.eup %1493  ;;  %1513 = vrcp.f32 %v871_v39  ;;  %v903_v10 = vadd.f32 1.0, %v1492_v44  ;;  %v2520_v50 = vadd.f32 %v2435_v49, %v554_v59  ;;  %v718_v33 = vsub.f32 0.0, %v2512_v27 }
 0x14c   :  { %v1496_v34 = vpop.eup %1495  ;;  %1124 = vst.msk [vmem:[%s2667_s4 + $0x88] sm:$0xff] %vm1106_vm1, %v1059_v2  ;;  %v876_v11 = vadd.f32 1.0, %v1494_v9  ;;  %1515 = vpow2.f32 %v834_v12  ;;  %v2525_v22 = vadd.f32 %v2435_v49, %v586_v18  ;;  %v782_v55 = vmul.f32 1.442695, %v688_v47 }
 0x14d   :  { %v1498_v6 = vpop.eup %1497  ;;  %1517 = vrcp.f32 %v903_v10  ;;  %v908_v48 = vadd.f32 1.0, %v1496_v34  ;;  %v2529_v8 = vadd.f32 %v2435_v49, %v552_v38  ;;  %v846_v56 = vmul.f32 1.442695, %v720_v20 }
 0x14e   :  { %v1500_v36 = vpop.eup %1499  ;;  %1519 = vrcp.f32 %v876_v11  ;;  %v874_v28 = vadd.f32 1.0, %v1498_v6  ;;  %v778_v53 = vmul.f32 1.442695, %v686_v57  ;;  %v689_v23 = vsub.f32 0.0, %v2520_v50 }
 0x14f   :  { %v1502_v29 = vpop.eup %1501  ;;  %v1091_v40 = vmul.f32 %v1500_v36, %v2291_v13  ;;  %1521 = vrcp.f32 %v908_v48  ;;  %v584_v3 = vmul.f32 %v2409_v14, %v2219_v31  ;;  %v721_v62 = vsub.f32 0.0, %v2525_v22 }
 0x150   :  { %v1504_v60 = vpop.eup %1503  ;;  %v1064_v45 = vmul.f32 %v1502_v29, %v2297_v43  ;;  %1523 = vrcp.f32 %v874_v28 }
 0x151   :  { %v1506_v12 = vpop.eup %1505  ;;  %1156 = vst.msk [vmem:[%s2667_s4 + $0x188] sm:$0xff] %vm1106_vm1, %v1091_v40  ;;  %v1096_v13 = vmul.f32 %v1504_v60, %v2308_v17  ;;  %1525 = vpow2.f32 %v776_v61  ;;  %v842_v61 = vmul.f32 1.442695, %v718_v33  ;;  %v2557_v14 = vadd.f32 %v2435_v49, %v584_v3 }
 0x152   :  { %v1508_v52 = vpop.eup %1507  ;;  %1129 = vst.msk [vmem:[%s2667_s4 + $0xb0] sm:$0xff] %vm1106_vm1, %v1064_v45  ;;  %v1062_v43 = vmul.f32 %v1506_v12, %v2316_v4  ;;  %1527 = vpow2.f32 %v840_v15  ;;  %v687_v4 = vsub.f32 0.0, %v2529_v8  ;;  %v784_v49 = vmul.f32 1.442695, %v689_v23 }
 0x153   :  { %v1510_v39 = vpop.eup %1509  ;;  %1161 = vst.msk [vmem:[%s2667_s4 + $0x1b0] sm:$0xff] %vm1106_vm1, %v1096_v13  ;;  %v1094_v17 = vmul.f32 %v1508_v52, %v2336_v21  ;;  %1529 = vpow2.f32 %v772_v35  ;;  %v719_v2 = vsub.f32 0.0, %v2557_v14  ;;  %v848_v24 = vmul.f32 1.442695, %v721_v62 }
 0x154   :  { %v1512_v44 = vpop.eup %1511  ;;  %1127 = vst.msk [vmem:[%s2667_s4 + $0xa0] sm:$0xff] %vm1106_vm1, %v1062_v43  ;;  %v1065_v31 = vmul.f32 %v1510_v39, %v2341_v32  ;;  %1531 = vpow2.f32 %v836_v54  ;;  %v780_v9 = vmul.f32 1.442695, %v687_v4 }
 0x155   :  { %v1514_v15 = vpop.eup %1513  ;;  %1159 = vst.msk [vmem:[%s2667_s4 + $0x1a0] sm:$0xff] %vm1106_vm1, %v1094_v17  ;;  %v1097_v21 = vmul.f32 %v1512_v44, %v2347_v26  ;;  %1533 = vpow2.f32 %v782_v55  ;;  %v844_v59 = vmul.f32 1.442695, %v719_v2 }
 0x156   :  { %v1516_v35 = vpop.eup %1515  ;;  %1130 = vst.msk [vmem:[%s2667_s4 + $0xb8] sm:$0xff] %vm1106_vm1, %v1065_v31  ;;  %v1063_v32 = vmul.f32 %v1514_v15, %v2350_v46  ;;  %1535 = vpow2.f32 %v846_v56 }
 0x157   :  { %v1518_v47 = vpop.eup %1517  ;;  %1162 = vst.msk [vmem:[%s2667_s4 + $0x1b8] sm:$0xff] %vm1106_vm1, %v1097_v21  ;;  %v906_v26 = vadd.f32 1.0, %v1516_v35  ;;  %1537 = vpow2.f32 %v778_v53 }
 0x158   :  { %v1520_v51 = vpop.eup %1519  ;;  %1128 = vst.msk [vmem:[%s2667_s4 + $0xa8] sm:$0xff] %vm1106_vm1, %v1063_v32  ;;  %v1095_v46 = vmul.f32 %v1518_v47, %v2365_v37  ;;  %1539 = vpow2.f32 %v842_v61 }
 0x159   :  { %v1522_v10 = vpop.eup %1521  ;;  %v1068_v20 = vmul.f32 %v1520_v51, %v2371_v1  ;;  %1541 = vrcp.f32 %v906_v26 }
 0x15a   :  { %v1524_v34 = vpop.eup %1523  ;;  %1160 = vst.msk [vmem:[%s2667_s4 + $0x1a8] sm:$0xff] %vm1106_vm1, %v1095_v46  ;;  %v1100_v11 = vmul.f32 %v1522_v10, %v2378_v5  ;;  %1543 = vpow2.f32 %v784_v49 }
 0x15b   :  { %v1526_v0 = vpop.eup %1525  ;;  %1133 = vst.msk [vmem:[%s2667_s4 + $0xd0] sm:$0xff] %vm1106_vm1, %v1068_v20  ;;  %v1066_v37 = vmul.f32 %v1524_v34, %v2387_v16  ;;  %1545 = vpow2.f32 %v848_v24 }
 0x15c   :  { %v1528_v1 = vpop.eup %1527  ;;  %1165 = vst.msk [vmem:[%s2667_s4 + $0x1d0] sm:$0xff] %vm1106_vm1, %v1100_v11  ;;  %v877_v18 = vadd.f32 1.0, %v1526_v0  ;;  %1547 = vpow2.f32 %v780_v9 }
 0x15d   :  { %v1530_v6 = vpop.eup %1529  ;;  %1131 = vst.msk [vmem:[%s2667_s4 + $0xc0] sm:$0xff] %vm1106_vm1, %v1066_v37  ;;  %v909_v5 = vadd.f32 1.0, %v1528_v1  ;;  %1549 = vpow2.f32 %v844_v59 }
 0x15e   :  { %v1532_v48 = vpop.eup %1531  ;;  %1551 = vrcp.f32 %v877_v18  ;;  %v875_v16 = vadd.f32 1.0, %v1530_v6 }
 0x15f   :  { %v1534_v57 = vpop.eup %1533  ;;  %1553 = vrcp.f32 %v909_v5  ;;  %v907_v38 = vadd.f32 1.0, %v1532_v48 }
 0x160   :  { %v1536_v36 = vpop.eup %1535  ;;  %1555 = vrcp.f32 %v875_v16  ;;  %v880_v28 = vadd.f32 1.0, %v1534_v57 }
 0x161   :  { %v1538_v54 = vpop.eup %1537  ;;  %1557 = vrcp.f32 %v907_v38  ;;  %v912_v29 = vadd.f32 1.0, %v1536_v36 }
 0x162   :  { %v1540_v40 = vpop.eup %1539  ;;  %1559 = vrcp.f32 %v880_v28  ;;  %v878_v33 = vadd.f32 1.0, %v1538_v54 }
 0x163   :  { %v1542_v60 = vpop.eup %1541  ;;  %1561 = vrcp.f32 %v912_v29  ;;  %v910_v45 = vadd.f32 1.0, %v1540_v40 }
 0x164   :  { %v1544_v55 = vpop.eup %1543  ;;  %v1098_v12 = vmul.f32 %v1542_v60, %v2438_v58  ;;  %1563 = vrcp.f32 %v878_v33 }
 0x165   :  { %v1546_v13 = vpop.eup %1545  ;;  %1565 = vrcp.f32 %v910_v45  ;;  %v881_v56 = vadd.f32 1.0, %v1544_v55 }
 0x166   :  { %v1548_v53 = vpop.eup %1547  ;;  %1163 = vst.msk [vmem:[%s2667_s4 + $0x1c0] sm:$0xff] %vm1106_vm1, %v1098_v12  ;;  %v913_v52 = vadd.f32 1.0, %v1546_v13 }
 0x167   :  { %v1550_v43 = vpop.eup %1549  ;;  %1567 = vrcp.f32 %v881_v56  ;;  %v879_v23 = vadd.f32 1.0, %v1548_v53 }
 0x168   :  { %v1552_v3 = vpop.eup %1551  ;;  %1569 = vrcp.f32 %v913_v52  ;;  %v911_v39 = vadd.f32 1.0, %v1550_v43 }
 0x169   :  { %v1554_v17 = vpop.eup %1553  ;;  %v1069_v58 = vmul.f32 %v1552_v3, %v2448_v30  ;;  %1571 = vrcp.f32 %v879_v23 }
 0x16a   :  { %v1556_v61 = vpop.eup %1555  ;;  %v1101_v62 = vmul.f32 %v1554_v17, %v2452_v41  ;;  %1573 = vrcp.f32 %v911_v39 }
 0x16b   :  { %v1558_v44 = vpop.eup %1557  ;;  %1134 = vst.msk [vmem:[%s2667_s4 + $0xd8] sm:$0xff] %vm1106_vm1, %v1069_v58  ;;  %v1067_v31 = vmul.f32 %v1556_v61, %v2460_v63 }
 0x16c   :  { %v1560_v4 = vpop.eup %1559  ;;  %1166 = vst.msk [vmem:[%s2667_s4 + $0x1d8] sm:$0xff] %vm1106_vm1, %v1101_v62  ;;  %v1099_v30 = vmul.f32 %v1558_v44, %v2486_v42 }
 0x16d   :  { %v1562_v15 = vpop.eup %1561  ;;  %1132 = vst.msk [vmem:[%s2667_s4 + $0xc8] sm:$0xff] %vm1106_vm1, %v1067_v31  ;;  %v1072_v41 = vmul.f32 %v1560_v4, %v2491_v19 }
 0x16e   :  { %v1564_v21 = vpop.eup %1563  ;;  %1164 = vst.msk [vmem:[%s2667_s4 + $0x1c8] sm:$0xff] %vm1106_vm1, %v1099_v30  ;;  %v1104_v63 = vmul.f32 %v1562_v15, %v2494_v25 }
 0x16f   :  { %v1566_v35 = vpop.eup %1565  ;;  %1137 = vst.msk [vmem:[%s2667_s4 + $0xf0] sm:$0xff] %vm1106_vm1, %v1072_v41  ;;  %v1070_v42 = vmul.f32 %v1564_v21, %v2498_v7 }
 0x170   :  { %1169 = vst.msk [vmem:[%s2667_s4 + $0x1f0] sm:$0xff] %vm1106_vm1, %v1104_v63  ;;  %v1102_v19 = vmul.f32 %v1566_v35, %v2512_v27 }
 0x171   :  { %v1568_v32 = vpop.eup %1567  ;;  %1135 = vst.msk [vmem:[%s2667_s4 + $0xe0] sm:$0xff] %vm1106_vm1, %v1070_v42 }
 0x172   :  { %v1570_v25 = vpop.eup %1569  ;;  %1167 = vst.msk [vmem:[%s2667_s4 + $0x1e0] sm:$0xff] %vm1106_vm1, %v1102_v19  ;;  %v1073_v7 = vmul.f32 %v1568_v32, %v2520_v50 }
 0x173   :  { %v1572_v49 = vpop.eup %1571  ;;  %v1105_v2 = vmul.f32 %v1570_v25, %v2525_v22 }
 0x174   :  { %v1574_v47 = vpop.eup %1573  ;;  %1138 = vst.msk [vmem:[%s2667_s4 + $0xf8] sm:$0xff] %vm1106_vm1, %v1073_v7  ;;  %v1071_v27 = vmul.f32 %v1572_v49, %v2529_v8 }
 0x175   :  { %1170 = vst.msk [vmem:[%s2667_s4 + $0x1f8] sm:$0xff] %vm1106_vm1, %v1105_v2  ;;  %v1103_v26 = vmul.f32 %v1574_v47, %v2557_v14 }
 0x176   :  { %1136 = vst.msk [vmem:[%s2667_s4 + $0xe8] sm:$0xff] %vm1106_vm1, %v1071_v27 }
 0x177   :  { %1168 = vst.msk [vmem:[%s2667_s4 + $0x1e8] sm:$0xff] %vm1106_vm1, %v1103_v26 }

</bundles_post_ra>
